<compile_context>
chip_gen: v7x
topology: tpu7x:2x2x1
jax: 0.10.0
libtpu: 0.0.40
codegen_flags: <defaults>
</compile_context>

<pallas_src>
import functools

import jax
import jax.numpy as jnp
from jax.experimental import pallas as pl
from jax.experimental.pallas import tpu as pltpu

EPS = 1e-5
HIDDEN = 256
CLASS_PAD = 128        # lane-dense padded class dimension
NEG_SENTINEL = -1e30   # finite mask value folded into the classifier bias


# ---------------------------------------------------------------------------
# Fused forward kernel
# ---------------------------------------------------------------------------
def _fused_forward_kernel(x_ref, adj_ref,
                          wpre_ref, bpre_ref,
                          w1_ref, b1_ref, w2_ref, b2_ref, w3_ref, b3_ref,
                          wp1_ref, bp1_ref, wp2_ref, bp2_ref,
                          o_ref):
    # ----- pre_layer + folded BN1 + relu  (dropout = identity in eval) -----
    x_bf = x_ref[...].astype(jnp.bfloat16)                        # tiny cast
    h = jnp.dot(x_bf, wpre_ref[...], preferred_element_type=jnp.float32)
    h = jnp.maximum(h + bpre_ref[...], 0.0)                       # (N, H) f32

    adj = adj_ref[...]            # (N, N) bf16 row-normalized mean adjacency

    def sage_layer(h_f32, w_ref, b_ref):
        # SAGEConv(mean): lin_l(A @ h) + lin_r(h); BN folded.
        # Two accumulating K=256 matmuls on static ref slices — no (N, 2H)
        # concat materialization, identical MXU work.
        h_bf = h_f32.astype(jnp.bfloat16)
        agg = jnp.dot(adj, h_bf, preferred_element_type=jnp.float32)
        y = jnp.dot(agg.astype(jnp.bfloat16), w_ref[0:HIDDEN, :],
                    preferred_element_type=jnp.float32)
        y = y + jnp.dot(h_bf, w_ref[HIDDEN:2 * HIDDEN, :],
                        preferred_element_type=jnp.float32)
        return jnp.maximum(y + b_ref[...], 0.0)

    h = sage_layer(h, w1_ref, b1_ref)     # conv1 + BN2 + relu
    h = sage_layer(h, w2_ref, b2_ref)     # conv2 + BN3 + relu
    h = sage_layer(h, w3_ref, b3_ref)     # conv3 + BN4 + relu

    # ----- post_layer1 + folded BN5 + relu -----
    y = jnp.dot(h.astype(jnp.bfloat16), wp1_ref[...],
                preferred_element_type=jnp.float32)
    y = jnp.maximum(y + bp1_ref[...], 0.0)

    # ----- post_layer2 (mask folded into bias) + log_softmax -----
    logits = jnp.dot(y.astype(jnp.bfloat16), wp2_ref[...],
                     preferred_element_type=jnp.float32)
    logits = logits + bp2_ref[...]        # padded lanes == -1e30 via bias
    m = jnp.max(logits, axis=-1, keepdims=True)
    z = logits - m
    lse = jnp.log(jnp.sum(jnp.exp(z), axis=-1, keepdims=True))
    o_ref[...] = z - lse


# ---------------------------------------------------------------------------
# Wrapper
# ---------------------------------------------------------------------------
def aaf_graphsage_forward(x, adj, params, num_classes):
    N, F = x.shape
    H, C = HIDDEN, CLASS_PAD

    ins = (x, adj,
           params["pre_w"], params["pre_b"],
           params["sage1_w"], params["sage1_b"],
           params["sage2_w"], params["sage2_b"],
           params["sage3_w"], params["sage3_b"],
           params["post1_w"], params["post1_b"],
           params["post2_w"], params["post2_b"])

    flops = 2 * N * (F * H + 3 * (N * H + 2 * H * H) + H * H + H * C)
    bytes_accessed = sum(int(a.size) * a.dtype.itemsize for a in ins) + N * C * 4
    cost = pl.CostEstimate(flops=flops,
                           transcendentals=N * (C + 1),
                           bytes_accessed=bytes_accessed)

    vmem = pl.BlockSpec(memory_space=pltpu.MemorySpace.VMEM)
    out = pl.pallas_call(
        _fused_forward_kernel,
        out_shape=jax.ShapeDtypeStruct((N, C), jnp.float32),
        in_specs=[vmem] * len(ins),
        out_specs=vmem,
        cost_estimate=cost,
        compiler_params=pltpu.CompilerParams(vmem_limit_bytes=32 << 20),
    )(*ins)
    return out[:, :num_classes]


# ---------------------------------------------------------------------------
# Parameter construction (mirrors torch shapes, then folds BN at setup time)
# ---------------------------------------------------------------------------
def make_linear_params(key, fan_in, fan_out):
    # torch.nn.Linear: weight (out,in), bias (out,), U(-1/sqrt(in), 1/sqrt(in))
    kw, kb = jax.random.split(key)
    bound = 1.0 / jnp.sqrt(float(fan_in))
    w = jax.random.uniform(kw, (fan_out, fan_in), jnp.float32, -bound, bound)
    b = jax.random.uniform(kb, (fan_out,), jnp.float32, -bound, bound)
    return w.T, b.reshape(1, fan_out)          # stored as (in,out) / (1,out)


def make_bn_params(key, dim):
    kg, kb, km, kv = jax.random.split(key, 4)
    g = jax.random.uniform(kg, (1, dim), jnp.float32, 0.5, 1.5)
    be = jax.random.uniform(kb, (1, dim), jnp.float32, -0.1, 0.1)
    mu = jax.random.uniform(km, (1, dim), jnp.float32, -0.1, 0.1)
    var = jax.random.uniform(kv, (1, dim), jnp.float32, 0.5, 1.5)
    return g, be, mu, var


def fold_bn_into_linear(w, b, bn):
    # eval-mode BN(x@W + b) == x@(W*s) + ((b - mu)*s + beta), s = g*rsqrt(var+eps)
    g, be, mu, var = bn
    s = g * jax.lax.rsqrt(var + EPS)
    return w * s, (b - mu) * s + be


def build_params(keys, num_features, num_classes):
    params = {}

    # pre_layer + BN1
    w, b = make_linear_params(keys[0], num_features, HIDDEN)
    w, b = fold_bn_into_linear(w, b, make_bn_params(keys[1], HIDDEN))
    params["pre_w"], params["pre_b"] = w.astype(jnp.bfloat16), b

    # SAGEConv layers (lin_l with bias on aggregated neighbors, lin_r no bias
    # on root features) + BN2/3/4, folded.  Stored concatenated along K; the
    # kernel uses free static ref slices [0:H] / [H:2H].
    for i, (kc, kbn) in enumerate(((keys[2], keys[3]),
                                   (keys[4], keys[5]),
                                   (keys[6], keys[7])), start=1):
        kl, kr = jax.random.split(kc)
        wl, bl = make_linear_params(kl, HIDDEN, HIDDEN)
        wr, _ = make_linear_params(kr, HIDDEN, HIDDEN)
        g, be, mu, var = make_bn_params(kbn, HIDDEN)
        s = g * jax.lax.rsqrt(var + EPS)
        wcat = jnp.concatenate([wl * s, wr * s], axis=0)        # (2H, H)
        bcat = (bl - mu) * s + be
        params[f"sage{i}_w"] = wcat.astype(jnp.bfloat16)
        params[f"sage{i}_b"] = bcat

    # post_layer1 + BN5
    w, b = make_linear_params(keys[8], HIDDEN, HIDDEN)
    w, b = fold_bn_into_linear(w, b, make_bn_params(keys[9], HIDDEN))
    params["post1_w"], params["post1_b"] = w.astype(jnp.bfloat16), b

    # post_layer2: weights zero-padded to CLASS_PAD lanes; the class mask is
    # folded into the bias (padded lanes = NEG_SENTINEL, finite).
    w, b = make_linear_params(keys[10], HIDDEN, num_classes)
    w_pad = jnp.zeros((HIDDEN, CLASS_PAD), jnp.float32).at[:, :num_classes].set(w)
    b_pad = jnp.full((1, CLASS_PAD), NEG_SENTINEL, jnp.float32)
    b_pad = b_pad.at[:, :num_classes].set(b)
    params["post2_w"] = w_pad.astype(jnp.bfloat16)
    params["post2_b"] = b_pad
    return params


def build_mean_adjacency(edge_index, num_nodes):
    # A_norm[i, j] = 1/deg_in(i) per incoming edge j -> i (mean aggregation).
    # Built once in bf16 so the kernel input needs no per-call wrapper cast.
    src, dst = edge_index[0], edge_index[1]
    a = jnp.zeros((num_nodes, num_nodes), jnp.float32)
    a = a.at[dst, src].add(1.0)
    deg = jnp.sum(a, axis=1, keepdims=True)
    return (a / jnp.maximum(deg, 1.0)).astype(jnp.bfloat16)


# ---------------------------------------------------------------------------
if __name__ == "__main__":
    NUM_NODES = 64
    NUM_FEATURES = 32
    NUM_CLASSES = 8
    NUM_EDGES = 256

    key = jax.random.PRNGKey(0)
    keys = jax.random.split(key, 16)

    # node features and random directed edge_index (2, E)
    x = jax.random.normal(keys[0], (NUM_NODES, NUM_FEATURES), jnp.float32)
    edge_index = jax.random.randint(keys[1], (2, NUM_EDGES), 0, NUM_NODES)
    adj = build_mean_adjacency(edge_index, NUM_NODES)

    params = build_params(keys[2:13], NUM_FEATURES, NUM_CLASSES)

    fwd = jax.jit(functools.partial(aaf_graphsage_forward,
                                    num_classes=NUM_CLASSES))
    out = fwd(x, adj, params)
    out = jax.block_until_ready(out)

    assert out.shape == (NUM_NODES, NUM_CLASSES)
    assert bool(jnp.all(jnp.isfinite(out)))
    # rows of log_softmax must exponentiate-sum to ~1
    row_sums = jnp.exp(out).sum(axis=1)
    assert bool(jnp.all(jnp.abs(row_sums - 1.0) < 1e-3))
    print("KERNEL_OK")
</pallas_src>

<mosaic_0001>
module attributes {stable_mosaic.version = 11 : i64} {
  func.func @_fused_forward_kernel(%arg0: memref<64x32xf32, #tpu.memory_space<vmem>>, %arg1: memref<64x64xbf16, #tpu.memory_space<vmem>>, %arg2: memref<32x256xbf16, #tpu.memory_space<vmem>>, %arg3: memref<1x256xf32, #tpu.memory_space<vmem>>, %arg4: memref<512x256xbf16, #tpu.memory_space<vmem>>, %arg5: memref<1x256xf32, #tpu.memory_space<vmem>>, %arg6: memref<512x256xbf16, #tpu.memory_space<vmem>>, %arg7: memref<1x256xf32, #tpu.memory_space<vmem>>, %arg8: memref<512x256xbf16, #tpu.memory_space<vmem>>, %arg9: memref<1x256xf32, #tpu.memory_space<vmem>>, %arg10: memref<256x256xbf16, #tpu.memory_space<vmem>>, %arg11: memref<1x256xf32, #tpu.memory_space<vmem>>, %arg12: memref<256x128xbf16, #tpu.memory_space<vmem>>, %arg13: memref<1x128xf32, #tpu.memory_space<vmem>>, %arg14: memref<64x128xf32, #tpu.memory_space<vmem>>) attributes {dimension_semantics = [], scalar_prefetch = 0 : i64, scratch_operands = 0 : i64, tpu.core_type = #tpu.core_type<tc>} {
    %c0 = arith.constant 0 : index
    %c0_0 = arith.constant 0 : index
    %0 = vector.load %arg0[%c0, %c0_0] : memref<64x32xf32, #tpu.memory_space<vmem>>, vector<64x32xf32>
    %1 = arith.truncf %0 : vector<64x32xf32> to vector<64x32xbf16>
    %c0_1 = arith.constant 0 : index
    %c0_2 = arith.constant 0 : index
    %2 = vector.load %arg2[%c0_1, %c0_2] : memref<32x256xbf16, #tpu.memory_space<vmem>>, vector<32x256xbf16>
    %cst = arith.constant dense<0.000000e+00> : vector<64x256xf32>
    %3 = tpu.matmul %1, %2, %cst {dimension_numbers = #tpu.dot_dimension_numbers<[1], [0], [0], [1], [0, 0, 1, 1], [], []>} : vector<64x32xbf16>, vector<32x256xbf16>, vector<64x256xf32> -> vector<64x256xf32>
    %c0_3 = arith.constant 0 : index
    %c0_4 = arith.constant 0 : index
    %4 = vector.load %arg3[%c0_3, %c0_4] : memref<1x256xf32, #tpu.memory_space<vmem>>, vector<1x256xf32>
    %5 = vector.broadcast %4 : vector<1x256xf32> to vector<64x256xf32>
    %6 = arith.addf %3, %5 : vector<64x256xf32>
    %cst_5 = arith.constant 0.000000e+00 : f32
    %7 = vector.broadcast %cst_5 : f32 to vector<64x256xf32>
    %8 = arith.maximumf %6, %7 : vector<64x256xf32>
    %c0_6 = arith.constant 0 : index
    %c0_7 = arith.constant 0 : index
    %9 = vector.load %arg1[%c0_6, %c0_7] : memref<64x64xbf16, #tpu.memory_space<vmem>>, vector<64x64xbf16>
    %10 = arith.truncf %8 : vector<64x256xf32> to vector<64x256xbf16>
    %cst_8 = arith.constant dense<0.000000e+00> : vector<64x256xf32>
    %11 = tpu.matmul %9, %10, %cst_8 {dimension_numbers = #tpu.dot_dimension_numbers<[1], [0], [0], [1], [0, 0, 1, 1], [], []>} : vector<64x64xbf16>, vector<64x256xbf16>, vector<64x256xf32> -> vector<64x256xf32>
    %12 = arith.truncf %11 : vector<64x256xf32> to vector<64x256xbf16>
    %c0_9 = arith.constant 0 : index
    %c0_10 = arith.constant 0 : index
    %13 = vector.load %arg4[%c0_9, %c0_10] : memref<512x256xbf16, #tpu.memory_space<vmem>>, vector<256x256xbf16>
    %cst_11 = arith.constant dense<0.000000e+00> : vector<64x256xf32>
    %14 = tpu.matmul %12, %13, %cst_11 {dimension_numbers = #tpu.dot_dimension_numbers<[1], [0], [0], [1], [0, 0, 1, 1], [], []>} : vector<64x256xbf16>, vector<256x256xbf16>, vector<64x256xf32> -> vector<64x256xf32>
    %c256 = arith.constant 256 : index
    %c0_12 = arith.constant 0 : index
    %15 = vector.load %arg4[%c256, %c0_12] : memref<512x256xbf16, #tpu.memory_space<vmem>>, vector<256x256xbf16>
    %cst_13 = arith.constant dense<0.000000e+00> : vector<64x256xf32>
    %16 = tpu.matmul %10, %15, %cst_13 {dimension_numbers = #tpu.dot_dimension_numbers<[1], [0], [0], [1], [0, 0, 1, 1], [], []>} : vector<64x256xbf16>, vector<256x256xbf16>, vector<64x256xf32> -> vector<64x256xf32>
    %17 = arith.addf %14, %16 : vector<64x256xf32>
    %c0_14 = arith.constant 0 : index
    %c0_15 = arith.constant 0 : index
    %18 = vector.load %arg5[%c0_14, %c0_15] : memref<1x256xf32, #tpu.memory_space<vmem>>, vector<1x256xf32>
    %19 = vector.broadcast %18 : vector<1x256xf32> to vector<64x256xf32>
    %20 = arith.addf %17, %19 : vector<64x256xf32>
    %cst_16 = arith.constant 0.000000e+00 : f32
    %21 = vector.broadcast %cst_16 : f32 to vector<64x256xf32>
    %22 = arith.maximumf %20, %21 : vector<64x256xf32>
    %23 = arith.truncf %22 : vector<64x256xf32> to vector<64x256xbf16>
    %cst_17 = arith.constant dense<0.000000e+00> : vector<64x256xf32>
    %24 = tpu.matmul %9, %23, %cst_17 {dimension_numbers = #tpu.dot_dimension_numbers<[1], [0], [0], [1], [0, 0, 1, 1], [], []>} : vector<64x64xbf16>, vector<64x256xbf16>, vector<64x256xf32> -> vector<64x256xf32>
    %25 = arith.truncf %24 : vector<64x256xf32> to vector<64x256xbf16>
    %c0_18 = arith.constant 0 : index
    %c0_19 = arith.constant 0 : index
    %26 = vector.load %arg6[%c0_18, %c0_19] : memref<512x256xbf16, #tpu.memory_space<vmem>>, vector<256x256xbf16>
    %cst_20 = arith.constant dense<0.000000e+00> : vector<64x256xf32>
    %27 = tpu.matmul %25, %26, %cst_20 {dimension_numbers = #tpu.dot_dimension_numbers<[1], [0], [0], [1], [0, 0, 1, 1], [], []>} : vector<64x256xbf16>, vector<256x256xbf16>, vector<64x256xf32> -> vector<64x256xf32>
    %c256_21 = arith.constant 256 : index
    %c0_22 = arith.constant 0 : index
    %28 = vector.load %arg6[%c256_21, %c0_22] : memref<512x256xbf16, #tpu.memory_space<vmem>>, vector<256x256xbf16>
    %cst_23 = arith.constant dense<0.000000e+00> : vector<64x256xf32>
    %29 = tpu.matmul %23, %28, %cst_23 {dimension_numbers = #tpu.dot_dimension_numbers<[1], [0], [0], [1], [0, 0, 1, 1], [], []>} : vector<64x256xbf16>, vector<256x256xbf16>, vector<64x256xf32> -> vector<64x256xf32>
    %30 = arith.addf %27, %29 : vector<64x256xf32>
    %c0_24 = arith.constant 0 : index
    %c0_25 = arith.constant 0 : index
    %31 = vector.load %arg7[%c0_24, %c0_25] : memref<1x256xf32, #tpu.memory_space<vmem>>, vector<1x256xf32>
    %32 = vector.broadcast %31 : vector<1x256xf32> to vector<64x256xf32>
    %33 = arith.addf %30, %32 : vector<64x256xf32>
    %cst_26 = arith.constant 0.000000e+00 : f32
    %34 = vector.broadcast %cst_26 : f32 to vector<64x256xf32>
    %35 = arith.maximumf %33, %34 : vector<64x256xf32>
    %36 = arith.truncf %35 : vector<64x256xf32> to vector<64x256xbf16>
    %cst_27 = arith.constant dense<0.000000e+00> : vector<64x256xf32>
    %37 = tpu.matmul %9, %36, %cst_27 {dimension_numbers = #tpu.dot_dimension_numbers<[1], [0], [0], [1], [0, 0, 1, 1], [], []>} : vector<64x64xbf16>, vector<64x256xbf16>, vector<64x256xf32> -> vector<64x256xf32>
    %38 = arith.truncf %37 : vector<64x256xf32> to vector<64x256xbf16>
    %c0_28 = arith.constant 0 : index
    %c0_29 = arith.constant 0 : index
    %39 = vector.load %arg8[%c0_28, %c0_29] : memref<512x256xbf16, #tpu.memory_space<vmem>>, vector<256x256xbf16>
    %cst_30 = arith.constant dense<0.000000e+00> : vector<64x256xf32>
    %40 = tpu.matmul %38, %39, %cst_30 {dimension_numbers = #tpu.dot_dimension_numbers<[1], [0], [0], [1], [0, 0, 1, 1], [], []>} : vector<64x256xbf16>, vector<256x256xbf16>, vector<64x256xf32> -> vector<64x256xf32>
    %c256_31 = arith.constant 256 : index
    %c0_32 = arith.constant 0 : index
    %41 = vector.load %arg8[%c256_31, %c0_32] : memref<512x256xbf16, #tpu.memory_space<vmem>>, vector<256x256xbf16>
    %cst_33 = arith.constant dense<0.000000e+00> : vector<64x256xf32>
    %42 = tpu.matmul %36, %41, %cst_33 {dimension_numbers = #tpu.dot_dimension_numbers<[1], [0], [0], [1], [0, 0, 1, 1], [], []>} : vector<64x256xbf16>, vector<256x256xbf16>, vector<64x256xf32> -> vector<64x256xf32>
    %43 = arith.addf %40, %42 : vector<64x256xf32>
    %c0_34 = arith.constant 0 : index
    %c0_35 = arith.constant 0 : index
    %44 = vector.load %arg9[%c0_34, %c0_35] : memref<1x256xf32, #tpu.memory_space<vmem>>, vector<1x256xf32>
    %45 = vector.broadcast %44 : vector<1x256xf32> to vector<64x256xf32>
    %46 = arith.addf %43, %45 : vector<64x256xf32>
    %cst_36 = arith.constant 0.000000e+00 : f32
    %47 = vector.broadcast %cst_36 : f32 to vector<64x256xf32>
    %48 = arith.maximumf %46, %47 : vector<64x256xf32>
    %49 = arith.truncf %48 : vector<64x256xf32> to vector<64x256xbf16>
    %c0_37 = arith.constant 0 : index
    %c0_38 = arith.constant 0 : index
    %50 = vector.load %arg10[%c0_37, %c0_38] : memref<256x256xbf16, #tpu.memory_space<vmem>>, vector<256x256xbf16>
    %cst_39 = arith.constant dense<0.000000e+00> : vector<64x256xf32>
    %51 = tpu.matmul %49, %50, %cst_39 {dimension_numbers = #tpu.dot_dimension_numbers<[1], [0], [0], [1], [0, 0, 1, 1], [], []>} : vector<64x256xbf16>, vector<256x256xbf16>, vector<64x256xf32> -> vector<64x256xf32>
    %c0_40 = arith.constant 0 : index
    %c0_41 = arith.constant 0 : index
    %52 = vector.load %arg11[%c0_40, %c0_41] : memref<1x256xf32, #tpu.memory_space<vmem>>, vector<1x256xf32>
    %53 = vector.broadcast %52 : vector<1x256xf32> to vector<64x256xf32>
    %54 = arith.addf %51, %53 : vector<64x256xf32>
    %cst_42 = arith.constant 0.000000e+00 : f32
    %55 = vector.broadcast %cst_42 : f32 to vector<64x256xf32>
    %56 = arith.maximumf %54, %55 : vector<64x256xf32>
    %57 = arith.truncf %56 : vector<64x256xf32> to vector<64x256xbf16>
    %c0_43 = arith.constant 0 : index
    %c0_44 = arith.constant 0 : index
    %58 = vector.load %arg12[%c0_43, %c0_44] : memref<256x128xbf16, #tpu.memory_space<vmem>>, vector<256x128xbf16>
    %cst_45 = arith.constant dense<0.000000e+00> : vector<64x128xf32>
    %59 = tpu.matmul %57, %58, %cst_45 {dimension_numbers = #tpu.dot_dimension_numbers<[1], [0], [0], [1], [0, 0, 1, 1], [], []>} : vector<64x256xbf16>, vector<256x128xbf16>, vector<64x128xf32> -> vector<64x128xf32>
    %c0_46 = arith.constant 0 : index
    %c0_47 = arith.constant 0 : index
    %60 = vector.load %arg13[%c0_46, %c0_47] : memref<1x128xf32, #tpu.memory_space<vmem>>, vector<1x128xf32>
    %61 = vector.broadcast %60 : vector<1x128xf32> to vector<64x128xf32>
    %62 = arith.addf %59, %61 : vector<64x128xf32>
    %cst_48 = arith.constant dense<0xFF800000> : vector<64xf32>
    %63 = vector.multi_reduction <maximumf>, %62, %cst_48 [1] : vector<64x128xf32> to vector<64xf32>
    %64 = vector.shape_cast %63 : vector<64xf32> to vector<64x1xf32>
    %65 = vector.broadcast %64 : vector<64x1xf32> to vector<64x128xf32>
    %66 = arith.subf %62, %65 : vector<64x128xf32>
    %67 = math.exp %66 : vector<64x128xf32>
    %cst_49 = arith.constant dense<0.000000e+00> : vector<64xf32>
    %68 = vector.multi_reduction <add>, %67, %cst_49 [1] : vector<64x128xf32> to vector<64xf32>
    %69 = vector.shape_cast %68 : vector<64xf32> to vector<64x1xf32>
    %70 = math.log %69 : vector<64x1xf32>
    %71 = vector.broadcast %70 : vector<64x1xf32> to vector<64x128xf32>
    %72 = arith.subf %66, %71 : vector<64x128xf32>
    %c0_50 = arith.constant 0 : index
    %c0_51 = arith.constant 0 : index
    %73 = vector.load %arg14[%c0_50, %c0_51] : memref<64x128xf32, #tpu.memory_space<vmem>>, vector<64x128xf32>
    tpu.vector_store %arg14[%c0_50, %c0_51], %72 {strides = array<i32>} : memref<64x128xf32, #tpu.memory_space<vmem>>, vector<64x128xf32>,
    return
  }
}

</mosaic_0001>

<bundles_post_ra>
// kernel: aaf_graphsage_forward.1
= control target key start
LH: loop header
LB: loop body
LE: loop exit
PB: predicated region body
PF: predicated region fallthrough
CT: control target
= control target key end

     0   :  { %19 = vsyncpa [#allocation3], 0  ;;  %s4224_s0 = inlined_call_operand.vmem [shape: f32[64,32], index: 0, kind: input, shape index: {}]   ;;  %s4225_s1 = inlined_call_operand.vmem [shape: bf16[64,64], index: 1, kind: input, shape index: {}]   ;;  %s4226_s2 = inlined_call_operand.vmem [shape: bf16[32,256], index: 2, kind: input, shape index: {}]   ;;  %s4227_s3 = inlined_call_operand.vmem [shape: f32[1,256], index: 3, kind: input, shape index: {}]   ;;  %s4228_s4 = inlined_call_operand.hbm [shape: bf16[512,256], index: 4, kind: input, shape index: {}]   ;;  %s4229_s5 = inlined_call_operand.vmem [shape: f32[1,256], index: 5, kind: input, shape index: {}]   ;;  %s4230_s6 = inlined_call_operand.hbm [shape: bf16[512,256], index: 6, kind: input, shape index: {}]   ;;  %s4231_s7 = inlined_call_operand.vmem [shape: f32[1,256], index: 7, kind: input, shape index: {}]   ;;  %s4232_s8 = inlined_call_operand.hbm [shape: bf16[512,256], index: 8, kind: input, shape index: {}]   ;;  %s4233_s9 = inlined_call_operand.vmem [shape: f32[1,256], index: 9, kind: input, shape index: {}]   ;;  %s4234_s10 = inlined_call_operand.hbm [shape: bf16[256,256], index: 10, kind: input, shape index: {}]   ;;  %s4235_s11 = inlined_call_operand.vmem [shape: f32[1,256], index: 11, kind: input, shape index: {}]   ;;  %s4236_s12 = inlined_call_operand.hbm [shape: bf16[256,128], index: 12, kind: input, shape index: {}]   ;;  %s4237_s13 = inlined_call_operand.vmem [shape: f32[1,128], index: 13, kind: input, shape index: {}]   ;;  %s4238_s14 = inlined_call_operand.vmem [shape: f32[64,128], index: 14, kind: output, shape index: {}]  }
   0x1   :  { %20 = vsyncpa [#allocation5], 0 }
   0x2   :  { %21 = vsyncpa [#allocation8], 0  ;;  %s3773_s29 = smov [#allocation4]   ;;  %s3774_s15 = smov [#allocation7]  }
   0x3   :  { %s49_s30 = sshll.u32 %s3773_s29, 4  ;;  %s77_s16 = sshll.u32 %s3774_s15, 4  ;;  %s50_s30 = int_to_ptr.vmem [resolvable:$true] %s49_s30  ;;  %s3858_s16 = int_to_ptr.vmem [resolvable:$true] %s77_s16 }
   0x4   :  { %s3657_s19 = scalar_lea.hbm %s4230_s6, 8192 }
   0x5   :  { %p3658_p0 = scmp.ne.s32.totalorder %s4230_s6, %s3657_s19  ;;  %p3661_p1 = scmp.lt.u32.totalorder %s3657_s19, %s4230_s6 }
   0x7   :  { %p3663_p2 = pnand %p3661_p1, %p3658_p0 }
   0x9   :  { %3666 = shalt.err (!%p3663_p2)
}
   0xa   :  { %s3667_s24 = scalar_lea.vmem %s50_s30, 8192  ;;  %p3672_p4 = scmp.lt.s32.totalorder %s50_s30, %s50_s30 }
   0xb   :  { %p3668_p3 = scmp.ne.s32.totalorder %s50_s30, %s3667_s24  ;;  %p3673_p5 = scmp.lt.s32.totalorder %s3667_s24, %s3667_s24 }
   0xd   :  { %p3674_p6 = por %p3673_p5, %p3672_p4 }
   0xf   :  { %p3675_p7 = pnand %p3674_p6, %p3668_p3 }
  0x11   :  { %3678 = shalt.err (!%p3675_p7)
}
  0x12   :  { %s3775_s25 = smov 128   ;;  %s3776_s26 = smov 8  }
  0x13   :  { %55 = dma.hbm_to_vmem [thread:$0]  %s4230_s6, 8192, %s50_s30, [#allocation5], %s3775_s25, %s3775_s25, %s3776_s26  }
  0x14   :  { %s3679_s17 = scalar_lea.hbm %s4234_s10, 4096 }
  0x15   :  { %p3680_p8 = scmp.ne.s32.totalorder %s4234_s10, %s3679_s17  ;;  %p3683_p9 = scmp.lt.u32.totalorder %s3679_s17, %s4234_s10 }
  0x17   :  { %p3685_p10 = pnand %p3683_p9, %p3680_p8 }
  0x19   :  { %3688 = shalt.err (!%p3685_p10)
}
  0x1a   :  { %s3689_s22 = scalar_lea.vmem %s3858_s16, 4096  ;;  %p3694_p12 = scmp.lt.s32.totalorder %s3858_s16, %s3858_s16 }
  0x1b   :  { %p3690_p11 = scmp.ne.s32.totalorder %s3858_s16, %s3689_s22  ;;  %p3695_p13 = scmp.lt.s32.totalorder %s3689_s22, %s3689_s22 }
  0x1d   :  { %p3696_p0 = por %p3695_p13, %p3694_p12 }
  0x1f   :  { %p3697_p1 = pnand %p3696_p0, %p3690_p11 }
  0x21   :  { %3700 = shalt.err (!%p3697_p1)
}
  0x22   :  { %83 = dma.hbm_to_vmem [thread:$0]  %s4234_s10, 4096, %s3858_s16, [#allocation8], %s3775_s25, %s3775_s25, %s3776_s26  }
  0x23   :  { %s3777_s23 = smov [#allocation2]   ;;  %s3778_s27 = smov [#allocation6]  }
  0x24   :  { %s35_s24 = sshll.u32 %s3777_s23, 4  ;;  %s63_s28 = sshll.u32 %s3778_s27, 4  ;;  %s36_s24 = int_to_ptr.vmem [resolvable:$true] %s35_s24  ;;  %s3895_s28 = int_to_ptr.vmem [resolvable:$true] %s63_s28 }
  0x25   :  { %s3701_s17 = scalar_lea.hbm %s4228_s4, 8192 }
  0x26   :  { %p3702_p2 = scmp.ne.s32.totalorder %s4228_s4, %s3701_s17  ;;  %p3705_p3 = scmp.lt.u32.totalorder %s3701_s17, %s4228_s4 }
  0x28   :  { %p3707_p4 = pnand %p3705_p3, %p3702_p2 }
  0x2a   :  { %3710 = shalt.err (!%p3707_p4)
}
  0x2b   :  { %s3711_s10 = scalar_lea.vmem %s36_s24, 8192  ;;  %p3716_p6 = scmp.lt.s32.totalorder %s36_s24, %s36_s24 }
  0x2c   :  { %p3712_p5 = scmp.ne.s32.totalorder %s36_s24, %s3711_s10  ;;  %p3717_p7 = scmp.lt.s32.totalorder %s3711_s10, %s3711_s10 }
  0x2e   :  { %p3718_p8 = por %p3717_p7, %p3716_p6 }
  0x30   :  { %p3719_p9 = pnand %p3718_p8, %p3712_p5 }
  0x32   :  { %3722 = shalt.err (!%p3719_p9)
}
  0x33   :  { %41 = dma.hbm_to_vmem [thread:$0]  %s4228_s4, 8192, %s36_s24, [#allocation3], %s3775_s25, %s3775_s25, %s3776_s26  }
  0x34   :  { %s3723_s23 = scalar_lea.hbm %s4232_s8, 8192 }
  0x35   :  { %p3724_p10 = scmp.ne.s32.totalorder %s4232_s8, %s3723_s23  ;;  %p3727_p11 = scmp.lt.u32.totalorder %s3723_s23, %s4232_s8 }
  0x37   :  { %p3729_p12 = pnand %p3727_p11, %p3724_p10 }
  0x39   :  { %3732 = shalt.err (!%p3729_p12)
}
  0x3a   :  { %s3733_s18 = scalar_lea.vmem %s3895_s28, 8192  ;;  %p3738_p0 = scmp.lt.s32.totalorder %s3895_s28, %s3895_s28 }
  0x3b   :  { %p3734_p13 = scmp.ne.s32.totalorder %s3895_s28, %s3733_s18  ;;  %p3739_p1 = scmp.lt.s32.totalorder %s3733_s18, %s3733_s18 }
  0x3d   :  { %p3740_p2 = por %p3739_p1, %p3738_p0 }
  0x3f   :  { %p3741_p3 = pnand %p3740_p2, %p3734_p13 }
  0x41   :  { %3744 = shalt.err (!%p3741_p3)
}
  0x42   :  { %69 = dma.hbm_to_vmem [thread:$0]  %s4232_s8, 8192, %s3895_s28, [#allocation5], %s3775_s25, %s3775_s25, %s3776_s26  }
  0x43   :  { %s3779_s19 = smov [#allocation9]   ;;  %s3745_s16 = scalar_lea.hbm %s4236_s12, 2048 }
  0x44   :  { %s91_s20 = sshll.u32 %s3779_s19, 4  ;;  %p3746_p4 = scmp.ne.s32.totalorder %s4236_s12, %s3745_s16  ;;  %s92_s20 = int_to_ptr.vmem [resolvable:$true] %s91_s20 }
  0x45   :  { %p3749_p5 = scmp.lt.u32.totalorder %s3745_s16, %s4236_s12 }
  0x47   :  { %p3751_p6 = pnand %p3749_p5, %p3746_p4 }
  0x49   :  { %3754 = shalt.err (!%p3751_p6)
}
  0x4a   :  { %s3755_s27 = scalar_lea.vmem %s92_s20, 2048  ;;  %p3760_p8 = scmp.lt.s32.totalorder %s92_s20, %s92_s20 }
  0x4b   :  { %p3756_p7 = scmp.ne.s32.totalorder %s92_s20, %s3755_s27  ;;  %p3761_p9 = scmp.lt.s32.totalorder %s3755_s27, %s3755_s27 }
  0x4d   :  { %p3762_p10 = por %p3761_p9, %p3760_p8 }
  0x4f   :  { %p3763_p11 = pnand %p3762_p10, %p3756_p7 }
  0x51   :  { %3766 = shalt.err (!%p3763_p11)
}
  0x52   :  { %s3780_s8 = smov 64   ;;  %s3781_s25 = smov 4  }
  0x53   :  { %97 = dma.hbm_to_vmem [thread:$0]  %s4236_s12, 2048, %s92_s20, [#allocation8], %s3780_s8, %s3780_s8, %s3781_s25  }
  0x54   :  { %3767 = dma.done.wait [#allocation3], 8192  }
  0x55   :  { %3768 = vsyncadd [#allocation3], 4294959104 }
  0x56   :  { %3769 = dma.done.wait [#allocation5], 16384  }
  0x57   :  { %3770 = vsyncadd [#allocation5], 4294950912 }
  0x58   :  { %3771 = dma.done.wait [#allocation8], 6144  }
  0x59   :  { %3772 = vsyncadd [#allocation8], 4294961152  ;;  %v3782_v0 = vmov 0   ;;  %v3263_v1 = vld [vmem:[%s4226_s2 + $0x4] ss:$8 sps:$4 sm:$0xff]   ;;  %vm164_vm0 = vcmask 261120   ;;  %v134_v50 = vlaneseq }
  0x5a   :  { %209 = vmatprep.mubr.bf16.mxu0 %v3782_v0  ;;  %347 = vmatprep.mubr.bf16.mxu1 %v3782_v0  ;;  %v3265_v2 = vld [vmem:[%s4226_s2] ss:$8 sps:$4 sm:$0xff]   ;;  %v3266_v3 = vld [vmem:[%s4226_s2 + $0x14] ss:$8 sps:$4 sm:$0xff]   ;;  %v3268_v4 = vld [vmem:[%s4226_s2 + $0x10] ss:$8 sps:$4 sm:$0xff]  }
  0x5b   :  { %177 = vmatprep.subr.bf16.mxu0 %v3263_v1  ;;  %v116_v5 = vld [vmem:[%s4224_s0] sm:$0xff]  ;;  %v117_v6 = vld [vmem:[%s4224_s0 + $0x8] sm:$0xff]  ;;  %v3274_v10 = vld [vmem:[#allocation2 + $0x114] ss:$8 sps:$4 sm:$0xff]   ;;  %v135_v51 = vshrl.u32 %v134_v50, 7  ;;  %vm302_vm1 = vcmask 523264  }
  0x5c   :  { %178 = vmatpush1.bf16.msra.mxu0 %v3265_v2  ;;  %v124_v7 = vpack.c.bf16 %v117_v6, %v116_v5  ;;  %v3271_v8 = vld [vmem:[#allocation2 + $0x104] ss:$8 sps:$4 sm:$0xff]   ;;  %v3269_v9 = vld [vmem:[#allocation2 + $0x100] ss:$8 sps:$4 sm:$0xff]   ;;  %v118_v11 = vld [vmem:[%s4224_s0 + $0x10] sm:$0xff] }
  0x5d   :  { %179 = vmatprep.subr.bf16.mxu0 %v3266_v3  ;;  %v119_v12 = vld [vmem:[%s4224_s0 + $0x18] sm:$0xff]  ;;  %v3277_v14 = vld [vmem:[#allocation2 + $0x124] ss:$8 sps:$4 sm:$0xff]   ;;  %v3275_v16 = vld [vmem:[#allocation2 + $0x120] ss:$8 sps:$4 sm:$0xff]   ;;  %v3989_v52 = vsub.s32 0, %v135_v51 }
  0x5e   :  { %v3272_v13 = vld [vmem:[#allocation2 + $0x110] ss:$8 sps:$4 sm:$0xff]   ;;  %v125_v15 = vpack.c.bf16 %v119_v12, %v118_v11  ;;  %v3280_v17 = vld [vmem:[#allocation2 + $0x134] ss:$8 sps:$4 sm:$0xff]   ;;  %v120_v18 = vld [vmem:[%s4224_s0 + $0x20] sm:$0xff]  ;;  %v3994_v54 = vsub.s32 1, %v135_v51 }
  0x5f   :  { %v121_v19 = vld [vmem:[%s4224_s0 + $0x28] sm:$0xff]  ;;  %v3278_v20 = vld [vmem:[#allocation2 + $0x130] ss:$8 sps:$4 sm:$0xff]   ;;  %v3286_v24 = vld [vmem:[#allocation2 + $0x154] ss:$8 sps:$4 sm:$0xff]  }
  0x60   :  { %180 = vmatpush1.bf16.msra.mxu0 %v3268_v4  ;;  %v3283_v21 = vld [vmem:[#allocation2 + $0x144] ss:$8 sps:$4 sm:$0xff]   ;;  %v126_v22 = vpack.c.bf16 %v121_v19, %v120_v18  ;;  %v3281_v23 = vld [vmem:[#allocation2 + $0x140] ss:$8 sps:$4 sm:$0xff]   ;;  %v122_v25 = vld [vmem:[%s4224_s0 + $0x30] sm:$0xff] }
  0x61   :  { %620 = vmatprep.subr.bf16.mxu0 %v3271_v8  ;;  %v123_v26 = vld [vmem:[%s4224_s0 + $0x38] sm:$0xff]  ;;  %v3289_v28 = vld [vmem:[#allocation2 + $0x164] ss:$8 sps:$4 sm:$0xff]   ;;  %v3287_v29 = vld [vmem:[#allocation2 + $0x160] ss:$8 sps:$4 sm:$0xff]  }
  0x62   :  { %v3284_v27 = vld [vmem:[#allocation2 + $0x150] ss:$8 sps:$4 sm:$0xff]   ;;  %v127_v30 = vpack.c.bf16 %v123_v26, %v122_v25  ;;  %v3292_v31 = vld [vmem:[#allocation2 + $0x174] ss:$8 sps:$4 sm:$0xff]   ;;  %v3295_v33 = vld [vmem:[#allocation2 + $0x184] ss:$8 sps:$4 sm:$0xff]  }
  0x63   :  { %2904 = vmatmul.mubr.msk.bf16.vlgmr.msra.gmra.mrb[0].mxu0 %vm164_vm0, %v124_v7  ;;  %v3290_v32 = vld [vmem:[#allocation2 + $0x170] ss:$8 sps:$4 sm:$0xff]   ;;  %v3293_v34 = vld [vmem:[#allocation2 + $0x180] ss:$8 sps:$4 sm:$0xff]   ;;  %v3298_v35 = vld [vmem:[#allocation2 + $0x194] ss:$8 sps:$4 sm:$0xff]  }
  0x64   :  { %219 = vmatprep.mubr.bf16.mxu0 %v3782_v0  ;;  %621 = vmatpush1.bf16.msra.mxu0 %v3269_v9  ;;  %v3296_v36 = vld [vmem:[#allocation2 + $0x190] ss:$8 sps:$4 sm:$0xff]   ;;  %v3301_v37 = vld [vmem:[#allocation2 + $0x1a4] ss:$8 sps:$4 sm:$0xff]   ;;  %v3299_v38 = vld [vmem:[#allocation2 + $0x1a0] ss:$8 sps:$4 sm:$0xff]  }
  0x65   :  { %622 = vmatprep.subr.bf16.mxu0 %v3274_v10  ;;  %v3304_v39 = vld [vmem:[#allocation2 + $0x1b4] ss:$8 sps:$4 sm:$0xff]   ;;  %v3302_v40 = vld [vmem:[#allocation2 + $0x1b0] ss:$8 sps:$4 sm:$0xff]   ;;  %v3307_v41 = vld [vmem:[#allocation2 + $0x1c4] ss:$8 sps:$4 sm:$0xff]  }
  0x66   :  { %v3305_v42 = vld [vmem:[#allocation2 + $0x1c0] ss:$8 sps:$4 sm:$0xff]   ;;  %v3310_v43 = vld [vmem:[#allocation2 + $0x1d4] ss:$8 sps:$4 sm:$0xff]   ;;  %v3308_v44 = vld [vmem:[#allocation2 + $0x1d0] ss:$8 sps:$4 sm:$0xff]  }
  0x67   :  { %v3313_v45 = vld [vmem:[#allocation2 + $0x1e4] ss:$8 sps:$4 sm:$0xff]   ;;  %v3311_v46 = vld [vmem:[#allocation2 + $0x1e0] ss:$8 sps:$4 sm:$0xff]   ;;  %v3316_v47 = vld [vmem:[#allocation2 + $0x1f4] ss:$8 sps:$4 sm:$0xff]  }
  0x68   :  { %623 = vmatpush1.bf16.msra.mxu0 %v3272_v13  ;;  %v3314_v48 = vld [vmem:[#allocation2 + $0x1f0] ss:$8 sps:$4 sm:$0xff]   ;;  %v3323_v49 = vld [vmem:[#allocation2 + $0x4] ss:$8 sps:$4 sm:$0xff]   ;;  %v132_v53 = vld [vmem:[%s4227_s3] sm:$0x3] }
  0x69   :  { %624 = vmatprep.subr.bf16.mxu0 %v3277_v14  ;;  %v3997_v55 = vrot.slane %v132_v53, %v3989_v52  ;;  %v4000_v56 = vrot.slane %v132_v53, %v3994_v54  ;;  %v3321_v9 = vld [vmem:[#allocation2] ss:$8 sps:$4 sm:$0xff]   ;;  %v3326_v12 = vld [vmem:[#allocation2 + $0x14] ss:$8 sps:$4 sm:$0xff]   ;;  %v3324_v18 = vld [vmem:[#allocation2 + $0x10] ss:$8 sps:$4 sm:$0xff]  }
  0x6b   :  { %2905 = vmatmul.mubr.msk.bf16.gmra.mrb[4].mxu0 %vm164_vm0, %v125_v15 }
  0x6c   :  { %229 = vmatprep.mubr.bf16.mxu0 %v3782_v0  ;;  %625 = vmatpush1.bf16.msra.mxu0 %v3275_v16 }
  0x6d   :  { %626 = vmatprep.subr.bf16.mxu0 %v3280_v17 }
  0x70   :  { %627 = vmatpush1.bf16.msra.mxu0 %v3278_v20 }
  0x71   :  { %628 = vmatprep.subr.bf16.mxu0 %v3283_v21  ;;  %v3329_v21 = vld [vmem:[#allocation2 + $0x24] ss:$8 sps:$4 sm:$0xff]  }
  0x73   :  { %2906 = vmatmul.mubr.msk.bf16.gmra.mrb[8].mxu0 %vm164_vm0, %v126_v22 }
  0x74   :  { %239 = vmatprep.mubr.bf16.mxu0 %v3782_v0  ;;  %629 = vmatpush1.bf16.msra.mxu0 %v3281_v23 }
  0x75   :  { %630 = vmatprep.subr.bf16.mxu0 %v3286_v24 }
  0x78   :  { %631 = vmatpush1.bf16.msra.mxu0 %v3284_v27  ;;  %v3327_v27 = vld [vmem:[#allocation2 + $0x20] ss:$8 sps:$4 sm:$0xff]  }
  0x79   :  { %632 = vmatprep.subr.bf16.mxu0 %v3289_v28 }
  0x7b   :  { %2907 = vmatmul.mubr.msk.bf16.gmra.mrb[12].mxu0 %vm164_vm0, %v127_v30  ;;  %v3332_v30 = vld [vmem:[#allocation2 + $0x34] ss:$8 sps:$4 sm:$0xff]  }
  0x7c   :  { %633 = vmatpush1.bf16.msra.mxu0 %v3287_v29 }
  0x7d   :  { %634 = vmatprep.subr.bf16.mxu0 %v3292_v31 }
  0x80   :  { %635 = vmatpush1.bf16.msra.mxu0 %v3290_v32 }
  0x81   :  { %636 = vmatprep.subr.bf16.mxu0 %v3295_v33 }
  0x84   :  { %637 = vmatpush1.bf16.msra.mxu0 %v3293_v34 }
  0x85   :  { %638 = vmatprep.subr.bf16.mxu0 %v3298_v35 }
  0x88   :  { %639 = vmatpush1.bf16.msra.mxu0 %v3296_v36  ;;  %v3330_v36 = vld [vmem:[#allocation2 + $0x30] ss:$8 sps:$4 sm:$0xff]  }
  0x89   :  { %640 = vmatprep.subr.bf16.mxu0 %v3301_v37 }
  0x8c   :  { %641 = vmatpush1.bf16.msra.mxu0 %v3299_v38 }
  0x8d   :  { %642 = vmatprep.subr.bf16.mxu0 %v3304_v39  ;;  %v3335_v39 = vld [vmem:[#allocation2 + $0x44] ss:$8 sps:$4 sm:$0xff]  }
  0x90   :  { %643 = vmatpush1.bf16.msra.mxu0 %v3302_v40 }
  0x91   :  { %644 = vmatprep.subr.bf16.mxu0 %v3307_v41 }
  0x94   :  { %645 = vmatpush1.bf16.msra.mxu0 %v3305_v42 }
  0x95   :  { %646 = vmatprep.subr.bf16.mxu0 %v3310_v43 }
  0x98   :  { %647 = vmatpush1.bf16.msra.mxu0 %v3308_v44 }
  0x99   :  { %648 = vmatprep.subr.bf16.mxu0 %v3313_v45  ;;  %v3333_v45 = vld [vmem:[#allocation2 + $0x40] ss:$8 sps:$4 sm:$0xff]  }
  0x9c   :  { %649 = vmatpush1.bf16.msra.mxu0 %v3311_v46 }
  0x9d   :  { %650 = vmatprep.subr.bf16.mxu0 %v3316_v47 }
  0xa0   :  { %651 = vmatpush1.bf16.msra.mxu0 %v3314_v48  ;;  %v3338_v48 = vld [vmem:[#allocation2 + $0x54] ss:$8 sps:$4 sm:$0xff]  }
  0xa1   :  { %853 = vmatprep.subr.bf16.mxu0 %v3323_v49 }
 0x136   :  { %v211_v57 = vpop.f32.mrb[0].mxu0 }
 0x137   :  { %v212_v58 = vadd.f32 %v211_v57, %v3997_v55  ;;  %v213_v59 = vpop.f32.mrb[1].mxu0 }
 0x138   :  { %v214_v60 = vadd.f32 %v213_v59, %v4000_v56  ;;  %v215_v61 = vpop.f32.mrb[2].mxu0 }
 0x139   :  { %v216_v62 = vadd.f32 %v215_v61, %v3997_v55  ;;  %v217_v63 = vpop.f32.mrb[3].mxu0  ;;  %v250_v2 = vmax.f32 %v212_v58, 0.0  ;;  %v3336_v58 = vld [vmem:[#allocation2 + $0x50] ss:$8 sps:$4 sm:$0xff]   ;;  %v3341_v61 = vld [vmem:[#allocation2 + $0x64] ss:$8 sps:$4 sm:$0xff]  }
 0x13a   :  { %v218_v1 = vadd.f32 %v217_v63, %v4000_v56  ;;  %v251_v4 = vmax.f32 %v214_v60, 0.0 }
 0x13b   :  { %v252_v3 = vmax.f32 %v216_v62, 0.0 }
 0x13c   :  { %v253_v5 = vmax.f32 %v218_v1, 0.0 }
 0x13d   :  { %v274_v6 = vpack.c.bf16 %v252_v3, %v250_v2  ;;  %v3339_v3 = vld [vmem:[#allocation2 + $0x60] ss:$8 sps:$4 sm:$0xff]  }
 0x13e   :  { %v221_v7 = vpop.f32.mrb[4].mxu0  ;;  %v275_v8 = vpack.c.bf16 %v253_v5, %v251_v4  ;;  %v3344_v4 = vld [vmem:[#allocation2 + $0x74] ss:$8 sps:$4 sm:$0xff]   ;;  %v3347_v5 = vld [vmem:[#allocation2 + $0x84] ss:$8 sps:$4 sm:$0xff]  }
 0x13f   :  { %v222_v10 = vadd.f32 %v221_v7, %v3997_v55  ;;  %v223_v11 = vpop.f32.mrb[5].mxu0  ;;  %v3350_v7 = vld [vmem:[#allocation2 + $0x94] ss:$8 sps:$4 sm:$0xff]  }
 0x140   :  { %v224_v13 = vadd.f32 %v223_v11, %v4000_v56  ;;  %v225_v14 = vpop.f32.mrb[6].mxu0  ;;  %315 = vmatprep.subr.bf16.mxu1 %v275_v8  ;;  %652 = vmatprep.mubr.bf16.mxu0 %v275_v8  ;;  %v4029_v8 = vld [vmem:[%s4225_s1 + $0x8] sm:$0xff]  }
 0x141   :  { %v226_v15 = vadd.f32 %v225_v14, %v3997_v55  ;;  %v227_v16 = vpop.f32.mrb[7].mxu0  ;;  %316 = vmatpush1.bf16.msra.mxu1 %v274_v6  ;;  %653 = vmatmul.mubr.bf16.vlgmr.msra.gmra.mrb[16].mxu0 %v274_v6  ;;  %v254_v19 = vmax.f32 %v222_v10, 0.0  ;;  %v3345_v6 = vld [vmem:[#allocation2 + $0x80] ss:$8 sps:$4 sm:$0xff]   ;;  %v3353_v10 = vld [vmem:[#allocation2 + $0xa4] ss:$8 sps:$4 sm:$0xff]  }
 0x142   :  { %v228_v17 = vadd.f32 %v227_v16, %v4000_v56  ;;  %854 = vmatpush1.bf16.msra.mxu0 %v3321_v9  ;;  %v255_v22 = vmax.f32 %v224_v13, 0.0  ;;  %v3348_v9 = vld [vmem:[#allocation2 + $0x90] ss:$8 sps:$4 sm:$0xff]   ;;  %v3351_v11 = vld [vmem:[#allocation2 + $0xa0] ss:$8 sps:$4 sm:$0xff]  }
 0x143   :  { %v256_v20 = vmax.f32 %v226_v15, 0.0  ;;  %855 = vmatprep.subr.bf16.mxu0 %v3326_v12  ;;  %v3356_v12 = vld [vmem:[#allocation2 + $0xb4] ss:$8 sps:$4 sm:$0xff]   ;;  %v3354_v14 = vld [vmem:[#allocation2 + $0xb0] ss:$8 sps:$4 sm:$0xff]  }
 0x144   :  { %v257_v23 = vmax.f32 %v228_v17, 0.0  ;;  %v4037_v13 = vld [vmem:[%s4225_s1 + $0x10] sm:$0xff]   ;;  %v3359_v15 = vld [vmem:[#allocation2 + $0xc4] ss:$8 sps:$4 sm:$0xff]   ;;  %v3357_v16 = vld [vmem:[#allocation2 + $0xc0] ss:$8 sps:$4 sm:$0xff]  }
 0x145   :  { %v276_v24 = vpack.c.bf16 %v256_v20, %v254_v19  ;;  %v3362_v17 = vld [vmem:[#allocation2 + $0xd4] ss:$8 sps:$4 sm:$0xff]   ;;  %v3360_v19 = vld [vmem:[#allocation2 + $0xd0] ss:$8 sps:$4 sm:$0xff]   ;;  %v3365_v20 = vld [vmem:[#allocation2 + $0xe4] ss:$8 sps:$4 sm:$0xff]  }
 0x146   :  { %v277_v25 = vpack.c.bf16 %v257_v23, %v255_v22  ;;  %v231_v26 = vpop.f32.mrb[8].mxu0  ;;  %856 = vmatpush1.bf16.msra.mxu0 %v3324_v18  ;;  %v4045_v18 = vld [vmem:[%s4225_s1 + $0x18] sm:$0xff]  }
 0x147   :  { %v232_v28 = vadd.f32 %v231_v26, %v3997_v55  ;;  %v233_v29 = vpop.f32.mrb[9].mxu0  ;;  %857 = vmatprep.subr.bf16.mxu0 %v3329_v21  ;;  %v3363_v21 = vld [vmem:[#allocation2 + $0xe0] ss:$8 sps:$4 sm:$0xff]   ;;  %v3368_v22 = vld [vmem:[#allocation2 + $0xf4] ss:$8 sps:$4 sm:$0xff]  }
 0x148   :  { %v234_v31 = vadd.f32 %v233_v29, %v4000_v56  ;;  %v235_v32 = vpop.f32.mrb[10].mxu0  ;;  %317 = vmatprep.subr.bf16.mxu1 %v277_v25  ;;  %662 = vmatprep.mubr.bf16.mxu0 %v277_v25  ;;  %v3366_v23 = vld [vmem:[#allocation2 + $0xf0] ss:$8 sps:$4 sm:$0xff]  }
 0x149   :  { %v236_v33 = vadd.f32 %v235_v32, %v3997_v55  ;;  %v237_v34 = vpop.f32.mrb[11].mxu0  ;;  %318 = vmatpush1.bf16.msra.mxu1 %v276_v24  ;;  %663 = vmatmul.mubr.bf16.gmra.mrb[20].mxu0 %v276_v24  ;;  %v258_v37 = vmax.f32 %v232_v28, 0.0 }
 0x14a   :  { %v238_v35 = vadd.f32 %v237_v34, %v4000_v56  ;;  %858 = vmatpush1.bf16.msra.mxu0 %v3327_v27  ;;  %v259_v40 = vmax.f32 %v234_v31, 0.0 }
 0x14b   :  { %v260_v38 = vmax.f32 %v236_v33, 0.0  ;;  %859 = vmatprep.subr.bf16.mxu0 %v3332_v30 }
 0x14c   :  { %v261_v41 = vmax.f32 %v238_v35, 0.0 }
 0x14d   :  { %v278_v42 = vpack.c.bf16 %v260_v38, %v258_v37 }
 0x14e   :  { %v279_v43 = vpack.c.bf16 %v261_v41, %v259_v40  ;;  %v241_v44 = vpop.f32.mrb[12].mxu0  ;;  %860 = vmatpush1.bf16.msra.mxu0 %v3330_v36 }
 0x14f   :  { %v242_v46 = vadd.f32 %v241_v44, %v3997_v55  ;;  %v243_v47 = vpop.f32.mrb[13].mxu0  ;;  %861 = vmatprep.subr.bf16.mxu0 %v3335_v39 }
 0x150   :  { %v244_v49 = vadd.f32 %v243_v47, %v4000_v56  ;;  %v245_v50 = vpop.f32.mrb[14].mxu0  ;;  %319 = vmatprep.subr.bf16.mxu1 %v279_v43  ;;  %672 = vmatprep.mubr.bf16.mxu0 %v279_v43 }
 0x151   :  { %v246_v51 = vadd.f32 %v245_v50, %v3997_v55  ;;  %v247_v53 = vpop.f32.mrb[15].mxu0  ;;  %320 = vmatpush1.bf16.msra.mxu1 %v278_v42  ;;  %673 = vmatmul.mubr.bf16.gmra.mrb[24].mxu0 %v278_v42  ;;  %v262_v59 = vmax.f32 %v242_v46, 0.0  ;;  %v4021_v55 = vld [vmem:[%s4225_s1] sm:$0xff]  }
 0x152   :  { %v248_v57 = vadd.f32 %v247_v53, %v4000_v56  ;;  %862 = vmatpush1.bf16.msra.mxu0 %v3333_v45  ;;  %v263_v62 = vmax.f32 %v244_v49, 0.0  ;;  %v3342_v56 = vld [vmem:[#allocation2 + $0x70] ss:$8 sps:$4 sm:$0xff]  }
 0x153   :  { %v264_v60 = vmax.f32 %v246_v51, 0.0  ;;  %863 = vmatprep.subr.bf16.mxu0 %v3338_v48  ;;  %v926_v48 = vld [vmem:[%s4229_s5] sm:$0x3] }
 0x154   :  { %v265_v63 = vmax.f32 %v248_v57, 0.0  ;;  %v931_v49 = vrot.slane %v926_v48, %v3989_v52  ;;  %v935_v50 = vrot.slane %v926_v48, %v3994_v54 }
 0x155   :  { %v280_v1 = vpack.c.bf16 %v264_v60, %v262_v59 }
 0x156   :  { %v281_v2 = vpack.c.bf16 %v265_v63, %v263_v62  ;;  %864 = vmatpush1.bf16.msra.mxu0 %v3336_v58 }
 0x157   :  { %865 = vmatprep.subr.bf16.mxu0 %v3341_v61 }
 0x158   :  { %321 = vmatprep.subr.bf16.mxu1 %v281_v2  ;;  %682 = vmatprep.mubr.bf16.mxu0 %v281_v2 }
 0x159   :  { %322 = vmatpush1.bf16.msra.mxu1 %v280_v1  ;;  %683 = vmatmul.mubr.bf16.gmra.mrb[28].mxu0 %v280_v1 }
 0x15a   :  { %866 = vmatpush1.bf16.msra.mxu0 %v3339_v3 }
 0x15b   :  { %867 = vmatprep.subr.bf16.mxu0 %v3344_v4 }
 0x15c   :  { %2912 = vmatmul.mubr.msk.bf16.vlgmr.msra.gmra.mrb[0].mxu1 %vm302_vm1, %v4021_v55 }
 0x15d   :  { %357 = vmatprep.mubr.bf16.mxu1 %v3782_v0 }
 0x15e   :  { %868 = vmatpush1.bf16.msra.mxu0 %v3342_v56 }
 0x15f   :  { %869 = vmatprep.subr.bf16.mxu0 %v3347_v5 }
 0x162   :  { %870 = vmatpush1.bf16.msra.mxu0 %v3345_v6 }
 0x163   :  { %871 = vmatprep.subr.bf16.mxu0 %v3350_v7 }
 0x164   :  { %2913 = vmatmul.mubr.msk.bf16.gmra.mrb[4].mxu1 %vm302_vm1, %v4029_v8 }
 0x165   :  { %367 = vmatprep.mubr.bf16.mxu1 %v3782_v0 }
 0x166   :  { %872 = vmatpush1.bf16.msra.mxu0 %v3348_v9 }
 0x167   :  { %873 = vmatprep.subr.bf16.mxu0 %v3353_v10 }
 0x16a   :  { %874 = vmatpush1.bf16.msra.mxu0 %v3351_v11 }
 0x16b   :  { %875 = vmatprep.subr.bf16.mxu0 %v3356_v12 }
 0x16c   :  { %2914 = vmatmul.mubr.msk.bf16.gmra.mrb[8].mxu1 %vm302_vm1, %v4037_v13 }
 0x16d   :  { %377 = vmatprep.mubr.bf16.mxu1 %v3782_v0 }
 0x16e   :  { %876 = vmatpush1.bf16.msra.mxu0 %v3354_v14 }
 0x16f   :  { %877 = vmatprep.subr.bf16.mxu0 %v3359_v15 }
 0x172   :  { %878 = vmatpush1.bf16.msra.mxu0 %v3357_v16 }
 0x173   :  { %879 = vmatprep.subr.bf16.mxu0 %v3362_v17 }
 0x174   :  { %2915 = vmatmul.mubr.msk.bf16.gmra.mrb[12].mxu1 %vm302_vm1, %v4045_v18 }
 0x175   :  { %1010 = vmatprep.mubr.bf16.mxu1 %v3782_v0 }
 0x176   :  { %880 = vmatpush1.bf16.msra.mxu0 %v3360_v19 }
 0x177   :  { %881 = vmatprep.subr.bf16.mxu0 %v3365_v20 }
 0x17a   :  { %882 = vmatpush1.bf16.msra.mxu0 %v3363_v21 }
 0x17b   :  { %883 = vmatprep.subr.bf16.mxu0 %v3368_v22 }
 0x17e   :  { %884 = vmatpush1.bf16.msra.mxu0 %v3366_v23 }
 0x22f   :  { %v349_v24 = vpop.f32.mrb[0].mxu1 }
 0x230   :  { %v351_v25 = vpop.f32.mrb[1].mxu1 }
 0x231   :  { %v353_v26 = vpop.f32.mrb[2].mxu1 }
 0x232   :  { %v388_v27 = vpack.c.bf16 %v353_v26, %v349_v24  ;;  %v355_v28 = vpop.f32.mrb[3].mxu1 }
 0x233   :  { %v389_v29 = vpack.c.bf16 %v355_v28, %v351_v25 }
 0x235   :  { %885 = vmatprep.mubr.bf16.mxu0 %v389_v29 }
 0x236   :  { %886 = vmatmul.mubr.bf16.vlgmr.msra.gmra.mrb[16].mxu0 %v388_v27 }
 0x237   :  { %v359_v30 = vpop.f32.mrb[4].mxu1 }
 0x238   :  { %v361_v31 = vpop.f32.mrb[5].mxu1 }
 0x239   :  { %v363_v32 = vpop.f32.mrb[6].mxu1 }
 0x23a   :  { %v390_v33 = vpack.c.bf16 %v363_v32, %v359_v30  ;;  %v365_v34 = vpop.f32.mrb[7].mxu1 }
 0x23b   :  { %v391_v35 = vpack.c.bf16 %v365_v34, %v361_v31 }
 0x23d   :  { %895 = vmatprep.mubr.bf16.mxu0 %v391_v35 }
 0x23e   :  { %896 = vmatmul.mubr.bf16.gmra.mrb[20].mxu0 %v390_v33 }
 0x23f   :  { %v369_v36 = vpop.f32.mrb[8].mxu1 }
 0x240   :  { %v371_v37 = vpop.f32.mrb[9].mxu1 }
 0x241   :  { %v373_v38 = vpop.f32.mrb[10].mxu1 }
 0x242   :  { %v392_v39 = vpack.c.bf16 %v373_v38, %v369_v36  ;;  %v375_v40 = vpop.f32.mrb[11].mxu1 }
 0x243   :  { %v393_v41 = vpack.c.bf16 %v375_v40, %v371_v37 }
 0x245   :  { %905 = vmatprep.mubr.bf16.mxu0 %v393_v41 }
 0x246   :  { %906 = vmatmul.mubr.bf16.gmra.mrb[24].mxu0 %v392_v39 }
 0x247   :  { %v379_v42 = vpop.f32.mrb[12].mxu1 }
 0x248   :  { %v381_v43 = vpop.f32.mrb[13].mxu1 }
 0x249   :  { %v383_v44 = vpop.f32.mrb[14].mxu1 }
 0x24a   :  { %v394_v45 = vpack.c.bf16 %v383_v44, %v379_v42  ;;  %v385_v46 = vpop.f32.mrb[15].mxu1 }
 0x24b   :  { %v395_v47 = vpack.c.bf16 %v385_v46, %v381_v43 }
 0x24d   :  { %915 = vmatprep.mubr.bf16.mxu0 %v395_v47 }
 0x24e   :  { %916 = vmatmul.mubr.bf16.gmra.mrb[28].mxu0 %v394_v45 }
 0x24f   :  { %1673 = vmatprep.mubr.bf16.mxu0 %v3782_v0 }
 0x309   :  { %v887_v51 = vpop.f32.mrb[16].mxu0 }
 0x30a   :  { %v938_v53 = vadd.f32 %v931_v49, %v887_v51  ;;  %v889_v57 = vpop.f32.mrb[17].mxu0 }
 0x30b   :  { %v939_v58 = vadd.f32 %v935_v50, %v889_v57  ;;  %v891_v59 = vpop.f32.mrb[18].mxu0  ;;  %v3369_v57 = vld [vmem:[#allocation4 + $0x100] ss:$8 sps:$4 sm:$0xff]  }
 0x30c   :  { %v940_v60 = vadd.f32 %v931_v49, %v891_v59  ;;  %v893_v61 = vpop.f32.mrb[19].mxu0  ;;  %v954_v63 = vmax.f32 %v938_v53, 0.0  ;;  %v3371_v53 = vld [vmem:[#allocation4 + $0x104] ss:$8 sps:$4 sm:$0xff]   ;;  %v3375_v59 = vld [vmem:[#allocation4 + $0x120] ss:$8 sps:$4 sm:$0xff]  }
 0x30d   :  { %v941_v62 = vadd.f32 %v935_v50, %v893_v61  ;;  %v955_v2 = vmax.f32 %v939_v58, 0.0  ;;  %v3377_v58 = vld [vmem:[#allocation4 + $0x124] ss:$8 sps:$4 sm:$0xff]   ;;  %v3378_v61 = vld [vmem:[#allocation4 + $0x130] ss:$8 sps:$4 sm:$0xff]  }
 0x30e   :  { %v956_v1 = vmax.f32 %v940_v60, 0.0  ;;  %v3380_v60 = vld [vmem:[#allocation4 + $0x134] ss:$8 sps:$4 sm:$0xff]  }
 0x30f   :  { %v957_v3 = vmax.f32 %v941_v62, 0.0  ;;  %v3383_v62 = vld [vmem:[#allocation4 + $0x144] ss:$8 sps:$4 sm:$0xff]  }
 0x310   :  { %v4056_v4 = vpack.c.bf16 %v956_v1, %v954_v63  ;;  %v3381_v63 = vld [vmem:[#allocation4 + $0x140] ss:$8 sps:$4 sm:$0xff]   ;;  %v3386_v1 = vld [vmem:[#allocation4 + $0x154] ss:$8 sps:$4 sm:$0xff]  }
 0x311   :  { %v4058_v56 = vpack.c.bf16 %v957_v3, %v955_v2  ;;  %v897_v5 = vpop.f32.mrb[20].mxu0  ;;  %v3384_v2 = vld [vmem:[#allocation4 + $0x150] ss:$8 sps:$4 sm:$0xff]   ;;  %v3389_v3 = vld [vmem:[#allocation4 + $0x164] ss:$8 sps:$4 sm:$0xff]  }
 0x312   :  { %v942_v6 = vadd.f32 %v931_v49, %v897_v5  ;;  %v899_v7 = vpop.f32.mrb[21].mxu0  ;;  %v3387_v5 = vld [vmem:[#allocation4 + $0x160] ss:$8 sps:$4 sm:$0xff]  }
 0x313   :  { %v943_v9 = vadd.f32 %v935_v50, %v899_v7  ;;  %v901_v10 = vpop.f32.mrb[22].mxu0  ;;  %978 = vmatprep.subr.bf16.mxu1 %v4058_v56  ;;  %v3390_v7 = vld [vmem:[#allocation4 + $0x170] ss:$8 sps:$4 sm:$0xff]  }
 0x314   :  { %v944_v11 = vadd.f32 %v931_v49, %v901_v10  ;;  %v903_v12 = vpop.f32.mrb[23].mxu0  ;;  %979 = vmatpush1.bf16.msra.mxu1 %v4056_v4  ;;  %v958_v15 = vmax.f32 %v942_v6, 0.0  ;;  %v3392_v6 = vld [vmem:[#allocation4 + $0x174] ss:$8 sps:$4 sm:$0xff]   ;;  %v3393_v10 = vld [vmem:[#allocation4 + $0x180] ss:$8 sps:$4 sm:$0xff]  }
 0x315   :  { %v945_v14 = vadd.f32 %v935_v50, %v903_v12  ;;  %v959_v17 = vmax.f32 %v943_v9, 0.0  ;;  %v3395_v9 = vld [vmem:[#allocation4 + $0x184] ss:$8 sps:$4 sm:$0xff]   ;;  %v3396_v12 = vld [vmem:[#allocation4 + $0x190] ss:$8 sps:$4 sm:$0xff]  }
 0x316   :  { %v960_v16 = vmax.f32 %v944_v11, 0.0  ;;  %v3398_v11 = vld [vmem:[#allocation4 + $0x194] ss:$8 sps:$4 sm:$0xff]  }
 0x317   :  { %v961_v19 = vmax.f32 %v945_v14, 0.0  ;;  %v3401_v14 = vld [vmem:[#allocation4 + $0x1a4] ss:$8 sps:$4 sm:$0xff]  }
 0x318   :  { %v4062_v20 = vpack.c.bf16 %v960_v16, %v958_v15  ;;  %v3399_v15 = vld [vmem:[#allocation4 + $0x1a0] ss:$8 sps:$4 sm:$0xff]   ;;  %v3404_v16 = vld [vmem:[#allocation4 + $0x1b4] ss:$8 sps:$4 sm:$0xff]  }
 0x319   :  { %v4064_v21 = vpack.c.bf16 %v961_v19, %v959_v17  ;;  %v907_v22 = vpop.f32.mrb[24].mxu0  ;;  %v3402_v17 = vld [vmem:[#allocation4 + $0x1b0] ss:$8 sps:$4 sm:$0xff]   ;;  %v3407_v19 = vld [vmem:[#allocation4 + $0x1c4] ss:$8 sps:$4 sm:$0xff]  }
 0x31a   :  { %v946_v23 = vadd.f32 %v931_v49, %v907_v22  ;;  %v909_v24 = vpop.f32.mrb[25].mxu0  ;;  %v3410_v22 = vld [vmem:[#allocation4 + $0x1d4] ss:$8 sps:$4 sm:$0xff]  }
 0x31b   :  { %v947_v25 = vadd.f32 %v935_v50, %v909_v24  ;;  %v911_v26 = vpop.f32.mrb[26].mxu0  ;;  %980 = vmatprep.subr.bf16.mxu1 %v4064_v21  ;;  %v3413_v24 = vld [vmem:[#allocation4 + $0x1e4] ss:$8 sps:$4 sm:$0xff]  }
 0x31c   :  { %v948_v27 = vadd.f32 %v931_v49, %v911_v26  ;;  %v913_v28 = vpop.f32.mrb[27].mxu0  ;;  %981 = vmatpush1.bf16.msra.mxu1 %v4062_v20  ;;  %v962_v30 = vmax.f32 %v946_v23, 0.0  ;;  %v3408_v23 = vld [vmem:[#allocation4 + $0x1d0] ss:$8 sps:$4 sm:$0xff]   ;;  %v3416_v26 = vld [vmem:[#allocation4 + $0x1f4] ss:$8 sps:$4 sm:$0xff]  }
 0x31d   :  { %v949_v29 = vadd.f32 %v935_v50, %v913_v28  ;;  %v963_v32 = vmax.f32 %v947_v25, 0.0  ;;  %v3411_v25 = vld [vmem:[#allocation4 + $0x1e0] ss:$8 sps:$4 sm:$0xff]   ;;  %v3419_v28 = vld [vmem:[#allocation4 + $0x4] ss:$8 sps:$4 sm:$0xff]  }
 0x31e   :  { %v964_v31 = vmax.f32 %v948_v27, 0.0  ;;  %v3414_v27 = vld [vmem:[#allocation4 + $0x1f0] ss:$8 sps:$4 sm:$0xff]  }
 0x31f   :  { %v965_v33 = vmax.f32 %v949_v29, 0.0  ;;  %v3417_v29 = vld [vmem:[#allocation4] ss:$8 sps:$4 sm:$0xff]  }
 0x320   :  { %v4068_v34 = vpack.c.bf16 %v964_v31, %v962_v30  ;;  %v3422_v30 = vld [vmem:[#allocation4 + $0x14] ss:$8 sps:$4 sm:$0xff]   ;;  %v3420_v31 = vld [vmem:[#allocation4 + $0x10] ss:$8 sps:$4 sm:$0xff]  }
 0x321   :  { %v4070_v35 = vpack.c.bf16 %v965_v33, %v963_v32  ;;  %v917_v36 = vpop.f32.mrb[28].mxu0  ;;  %v3425_v32 = vld [vmem:[#allocation4 + $0x24] ss:$8 sps:$4 sm:$0xff]   ;;  %v3423_v33 = vld [vmem:[#allocation4 + $0x20] ss:$8 sps:$4 sm:$0xff]  }
 0x322   :  { %v950_v37 = vadd.f32 %v931_v49, %v917_v36  ;;  %v919_v38 = vpop.f32.mrb[29].mxu0  ;;  %v3428_v36 = vld [vmem:[#allocation4 + $0x34] ss:$8 sps:$4 sm:$0xff]  }
 0x323   :  { %v951_v39 = vadd.f32 %v935_v50, %v919_v38  ;;  %v921_v40 = vpop.f32.mrb[30].mxu0  ;;  %982 = vmatprep.subr.bf16.mxu1 %v4070_v35  ;;  %v3431_v38 = vld [vmem:[#allocation4 + $0x44] ss:$8 sps:$4 sm:$0xff]  }
 0x324   :  { %v952_v41 = vadd.f32 %v931_v49, %v921_v40  ;;  %v923_v42 = vpop.f32.mrb[31].mxu0  ;;  %983 = vmatpush1.bf16.msra.mxu1 %v4068_v34  ;;  %v966_v44 = vmax.f32 %v950_v37, 0.0  ;;  %v3374_v49 = vld [vmem:[#allocation4 + $0x114] ss:$8 sps:$4 sm:$0xff]   ;;  %v3426_v37 = vld [vmem:[#allocation4 + $0x30] ss:$8 sps:$4 sm:$0xff]  }
 0x325   :  { %v953_v43 = vadd.f32 %v935_v50, %v923_v42  ;;  %v967_v46 = vmax.f32 %v951_v39, 0.0  ;;  %v3372_v50 = vld [vmem:[#allocation4 + $0x110] ss:$8 sps:$4 sm:$0xff]   ;;  %v3437_v40 = vld [vmem:[#allocation4 + $0x64] ss:$8 sps:$4 sm:$0xff]  }
 0x326   :  { %v968_v45 = vmax.f32 %v952_v41, 0.0  ;;  %v3432_v39 = vld [vmem:[#allocation4 + $0x50] ss:$8 sps:$4 sm:$0xff]   ;;  %v3443_v42 = vld [vmem:[#allocation4 + $0x84] ss:$8 sps:$4 sm:$0xff]  }
 0x327   :  { %v969_v47 = vmax.f32 %v953_v43, 0.0  ;;  %v3438_v41 = vld [vmem:[#allocation4 + $0x70] ss:$8 sps:$4 sm:$0xff]   ;;  %v3441_v43 = vld [vmem:[#allocation4 + $0x80] ss:$8 sps:$4 sm:$0xff]  }
 0x328   :  { %v4074_v48 = vpack.c.bf16 %v968_v45, %v966_v44  ;;  %v3444_v44 = vld [vmem:[#allocation4 + $0x90] ss:$8 sps:$4 sm:$0xff]   ;;  %v3449_v45 = vld [vmem:[#allocation4 + $0xa4] ss:$8 sps:$4 sm:$0xff]  }
 0x329   :  { %v4076_v51 = vpack.c.bf16 %v969_v47, %v967_v46  ;;  %v3447_v46 = vld [vmem:[#allocation4 + $0xa0] ss:$8 sps:$4 sm:$0xff]   ;;  %v3452_v47 = vld [vmem:[#allocation4 + $0xb4] ss:$8 sps:$4 sm:$0xff]  }
 0x32b   :  { %984 = vmatprep.subr.bf16.mxu1 %v4076_v51 }
 0x32c   :  { %985 = vmatpush1.bf16.msra.mxu1 %v4074_v48 }
 0x32d   :  { %1283 = vmatprep.subr.bf16.mxu1 %v3371_v53  ;;  %v3453_v53 = vld [vmem:[#allocation4 + $0xc0] ss:$8 sps:$4 sm:$0xff]  }
 0x32f   :  { %2980 = vmatmul.mubr.msk.bf16.vlgmr.msra.gmra.mrb[16].mxu1 %vm302_vm1, %v4021_v55 }
 0x330   :  { %1284 = vmatpush1.bf16.msra.mxu1 %v3369_v57  ;;  %1020 = vmatprep.mubr.bf16.mxu1 %v3782_v0  ;;  %v3458_v57 = vld [vmem:[#allocation4 + $0xd4] ss:$8 sps:$4 sm:$0xff]  }
 0x331   :  { %1285 = vmatprep.subr.bf16.mxu1 %v3374_v49  ;;  %v3456_v49 = vld [vmem:[#allocation4 + $0xd0] ss:$8 sps:$4 sm:$0xff]  }
 0x334   :  { %1286 = vmatpush1.bf16.msra.mxu1 %v3372_v50  ;;  %v3461_v50 = vld [vmem:[#allocation4 + $0xe4] ss:$8 sps:$4 sm:$0xff]  }
 0x335   :  { %1287 = vmatprep.subr.bf16.mxu1 %v3377_v58  ;;  %v3459_v58 = vld [vmem:[#allocation4 + $0xe0] ss:$8 sps:$4 sm:$0xff]  }
 0x337   :  { %2981 = vmatmul.mubr.msk.bf16.gmra.mrb[20].mxu1 %vm302_vm1, %v4029_v8 }
 0x338   :  { %1288 = vmatpush1.bf16.msra.mxu1 %v3375_v59  ;;  %1030 = vmatprep.mubr.bf16.mxu1 %v3782_v0  ;;  %v3464_v59 = vld [vmem:[#allocation4 + $0xf4] ss:$8 sps:$4 sm:$0xff]  }
 0x339   :  { %1289 = vmatprep.subr.bf16.mxu1 %v3380_v60  ;;  %v3462_v60 = vld [vmem:[#allocation4 + $0xf0] ss:$8 sps:$4 sm:$0xff]  }
 0x33c   :  { %1290 = vmatpush1.bf16.msra.mxu1 %v3378_v61 }
 0x33d   :  { %1291 = vmatprep.subr.bf16.mxu1 %v3383_v62 }
 0x33f   :  { %2982 = vmatmul.mubr.msk.bf16.gmra.mrb[24].mxu1 %vm302_vm1, %v4037_v13 }
 0x340   :  { %1292 = vmatpush1.bf16.msra.mxu1 %v3381_v63  ;;  %1040 = vmatprep.mubr.bf16.mxu1 %v3782_v0 }
 0x341   :  { %1293 = vmatprep.subr.bf16.mxu1 %v3386_v1 }
 0x344   :  { %1294 = vmatpush1.bf16.msra.mxu1 %v3384_v2 }
 0x345   :  { %1295 = vmatprep.subr.bf16.mxu1 %v3389_v3 }
 0x347   :  { %2983 = vmatmul.mubr.msk.bf16.gmra.mrb[28].mxu1 %vm302_vm1, %v4045_v18 }
 0x348   :  { %1296 = vmatpush1.bf16.msra.mxu1 %v3387_v5  ;;  %1315 = vmatprep.mubr.bf16.mxu1 %v4058_v56  ;;  %v3405_v56 = vld [vmem:[#allocation4 + $0x1c0] ss:$8 sps:$4 sm:$0xff]  }
 0x349   :  { %1297 = vmatprep.subr.bf16.mxu1 %v3392_v6 }
 0x34c   :  { %1298 = vmatpush1.bf16.msra.mxu1 %v3390_v7 }
 0x34d   :  { %1299 = vmatprep.subr.bf16.mxu1 %v3395_v9 }
 0x350   :  { %1300 = vmatpush1.bf16.msra.mxu1 %v3393_v10 }
 0x351   :  { %1301 = vmatprep.subr.bf16.mxu1 %v3398_v11 }
 0x354   :  { %1302 = vmatpush1.bf16.msra.mxu1 %v3396_v12 }
 0x355   :  { %1303 = vmatprep.subr.bf16.mxu1 %v3401_v14 }
 0x358   :  { %1304 = vmatpush1.bf16.msra.mxu1 %v3399_v15 }
 0x359   :  { %1305 = vmatprep.subr.bf16.mxu1 %v3404_v16 }
 0x35c   :  { %1306 = vmatpush1.bf16.msra.mxu1 %v3402_v17 }
 0x35d   :  { %1307 = vmatprep.subr.bf16.mxu1 %v3407_v19 }
 0x360   :  { %1308 = vmatpush1.bf16.msra.mxu1 %v3405_v56 }
 0x361   :  { %1309 = vmatprep.subr.bf16.mxu1 %v3410_v22 }
 0x364   :  { %1310 = vmatpush1.bf16.msra.mxu1 %v3408_v23 }
 0x365   :  { %1311 = vmatprep.subr.bf16.mxu1 %v3413_v24 }
 0x368   :  { %1312 = vmatpush1.bf16.msra.mxu1 %v3411_v25 }
 0x369   :  { %1313 = vmatprep.subr.bf16.mxu1 %v3416_v26 }
 0x36c   :  { %1314 = vmatpush1.bf16.msra.mxu1 %v3414_v27  ;;  %v1589_v27 = vld [vmem:[%s4231_s7] sm:$0x3] }
 0x36d   :  { %1516 = vmatprep.subr.bf16.mxu1 %v3419_v28  ;;  %v1594_v28 = vrot.slane %v1589_v27, %v3989_v52 }
 0x36f   :  { %1316 = vmatmul.mubr.bf16.vlgmr.msra.gmra.mrb[32].mxu1 %v4056_v4  ;;  %v3429_v4 = vld [vmem:[#allocation4 + $0x40] ss:$8 sps:$4 sm:$0xff]  }
 0x370   :  { %1325 = vmatprep.mubr.bf16.mxu1 %v4064_v21  ;;  %1517 = vmatpush1.bf16.msra.mxu1 %v3417_v29  ;;  %v3434_v21 = vld [vmem:[#allocation4 + $0x54] ss:$8 sps:$4 sm:$0xff]   ;;  %v1598_v29 = vrot.slane %v1589_v27, %v3994_v54 }
 0x371   :  { %1518 = vmatprep.subr.bf16.mxu1 %v3422_v30 }
 0x374   :  { %1519 = vmatpush1.bf16.msra.mxu1 %v3420_v31 }
 0x375   :  { %1520 = vmatprep.subr.bf16.mxu1 %v3425_v32 }
 0x377   :  { %1326 = vmatmul.mubr.bf16.gmra.mrb[36].mxu1 %v4062_v20  ;;  %v3435_v20 = vld [vmem:[#allocation4 + $0x60] ss:$8 sps:$4 sm:$0xff]  }
 0x378   :  { %1335 = vmatprep.mubr.bf16.mxu1 %v4070_v35  ;;  %1521 = vmatpush1.bf16.msra.mxu1 %v3423_v33  ;;  %v3440_v35 = vld [vmem:[#allocation4 + $0x74] ss:$8 sps:$4 sm:$0xff]  }
 0x379   :  { %1522 = vmatprep.subr.bf16.mxu1 %v3428_v36 }
 0x37c   :  { %1523 = vmatpush1.bf16.msra.mxu1 %v3426_v37 }
 0x37d   :  { %1524 = vmatprep.subr.bf16.mxu1 %v3431_v38 }
 0x37f   :  { %1336 = vmatmul.mubr.bf16.gmra.mrb[40].mxu1 %v4068_v34  ;;  %v3446_v34 = vld [vmem:[#allocation4 + $0x94] ss:$8 sps:$4 sm:$0xff]  }
 0x380   :  { %1345 = vmatprep.mubr.bf16.mxu1 %v4076_v51  ;;  %1525 = vmatpush1.bf16.msra.mxu1 %v3429_v4  ;;  %v3450_v51 = vld [vmem:[#allocation4 + $0xb0] ss:$8 sps:$4 sm:$0xff]  }
 0x381   :  { %1526 = vmatprep.subr.bf16.mxu1 %v3434_v21 }
 0x384   :  { %1527 = vmatpush1.bf16.msra.mxu1 %v3432_v39 }
 0x385   :  { %1528 = vmatprep.subr.bf16.mxu1 %v3437_v40 }
 0x387   :  { %1346 = vmatmul.mubr.bf16.gmra.mrb[44].mxu1 %v4074_v48  ;;  %v3455_v48 = vld [vmem:[#allocation4 + $0xc4] ss:$8 sps:$4 sm:$0xff]  }
 0x388   :  { %1529 = vmatpush1.bf16.msra.mxu1 %v3435_v20 }
 0x389   :  { %1530 = vmatprep.subr.bf16.mxu1 %v3440_v35 }
 0x38c   :  { %1531 = vmatpush1.bf16.msra.mxu1 %v3438_v41 }
 0x38d   :  { %1532 = vmatprep.subr.bf16.mxu1 %v3443_v42 }
 0x390   :  { %1533 = vmatpush1.bf16.msra.mxu1 %v3441_v43 }
 0x391   :  { %1534 = vmatprep.subr.bf16.mxu1 %v3446_v34 }
 0x394   :  { %1535 = vmatpush1.bf16.msra.mxu1 %v3444_v44 }
 0x395   :  { %1536 = vmatprep.subr.bf16.mxu1 %v3449_v45 }
 0x398   :  { %1537 = vmatpush1.bf16.msra.mxu1 %v3447_v46 }
 0x399   :  { %1538 = vmatprep.subr.bf16.mxu1 %v3452_v47 }
 0x39c   :  { %1539 = vmatpush1.bf16.msra.mxu1 %v3450_v51 }
 0x39d   :  { %1540 = vmatprep.subr.bf16.mxu1 %v3455_v48 }
 0x3a0   :  { %1541 = vmatpush1.bf16.msra.mxu1 %v3453_v53 }
 0x3a1   :  { %1542 = vmatprep.subr.bf16.mxu1 %v3458_v57 }
 0x3a4   :  { %1543 = vmatpush1.bf16.msra.mxu1 %v3456_v49 }
 0x3a5   :  { %1544 = vmatprep.subr.bf16.mxu1 %v3461_v50 }
 0x3a8   :  { %1545 = vmatpush1.bf16.msra.mxu1 %v3459_v58 }
 0x3a9   :  { %1546 = vmatprep.subr.bf16.mxu1 %v3464_v59 }
 0x3ac   :  { %1547 = vmatpush1.bf16.msra.mxu1 %v3462_v60 }
 0x402   :  { %v1012_v61 = vpop.f32.mrb[16].mxu1 }
 0x403   :  { %v1014_v62 = vpop.f32.mrb[17].mxu1 }
 0x404   :  { %v1016_v63 = vpop.f32.mrb[18].mxu1 }
 0x405   :  { %v1051_v1 = vpack.c.bf16 %v1016_v63, %v1012_v61  ;;  %v1018_v2 = vpop.f32.mrb[19].mxu1 }
 0x406   :  { %v1052_v3 = vpack.c.bf16 %v1018_v2, %v1014_v62 }
 0x408   :  { %1548 = vmatprep.mubr.bf16.mxu1 %v1052_v3 }
 0x409   :  { %1549 = vmatmul.mubr.bf16.vlgmr.msra.gmra.mrb[32].mxu1 %v1051_v1 }
 0x40a   :  { %v1022_v5 = vpop.f32.mrb[20].mxu1 }
 0x40b   :  { %v1024_v6 = vpop.f32.mrb[21].mxu1 }
 0x40c   :  { %v1026_v7 = vpop.f32.mrb[22].mxu1 }
 0x40d   :  { %v1053_v9 = vpack.c.bf16 %v1026_v7, %v1022_v5  ;;  %v1028_v10 = vpop.f32.mrb[23].mxu1 }
 0x40e   :  { %v1054_v11 = vpack.c.bf16 %v1028_v10, %v1024_v6 }
 0x410   :  { %1558 = vmatprep.mubr.bf16.mxu1 %v1054_v11 }
 0x411   :  { %1559 = vmatmul.mubr.bf16.gmra.mrb[36].mxu1 %v1053_v9 }
 0x412   :  { %v1032_v12 = vpop.f32.mrb[24].mxu1 }
 0x413   :  { %v1034_v14 = vpop.f32.mrb[25].mxu1 }
 0x414   :  { %v1036_v15 = vpop.f32.mrb[26].mxu1 }
 0x415   :  { %v1055_v16 = vpack.c.bf16 %v1036_v15, %v1032_v12  ;;  %v1038_v17 = vpop.f32.mrb[27].mxu1 }
 0x416   :  { %v1056_v19 = vpack.c.bf16 %v1038_v17, %v1034_v14 }
 0x418   :  { %1568 = vmatprep.mubr.bf16.mxu1 %v1056_v19 }
 0x419   :  { %1569 = vmatmul.mubr.bf16.gmra.mrb[40].mxu1 %v1055_v16 }
 0x41a   :  { %v1042_v56 = vpop.f32.mrb[28].mxu1 }
 0x41b   :  { %v1044_v22 = vpop.f32.mrb[29].mxu1 }
 0x41c   :  { %v1046_v23 = vpop.f32.mrb[30].mxu1 }
 0x41d   :  { %v1057_v24 = vpack.c.bf16 %v1046_v23, %v1042_v56  ;;  %v1048_v25 = vpop.f32.mrb[31].mxu1 }
 0x41e   :  { %v1058_v26 = vpack.c.bf16 %v1048_v25, %v1044_v22 }
 0x420   :  { %1578 = vmatprep.mubr.bf16.mxu1 %v1058_v26 }
 0x421   :  { %1579 = vmatmul.mubr.bf16.gmra.mrb[44].mxu1 %v1057_v24 }
 0x4dc   :  { %v1550_v30 = vpop.f32.mrb[32].mxu1 }
 0x4dd   :  { %v1601_v31 = vadd.f32 %v1594_v28, %v1550_v30  ;;  %v1552_v32 = vpop.f32.mrb[33].mxu1 }
 0x4de   :  { %v1602_v33 = vadd.f32 %v1598_v29, %v1552_v32  ;;  %v1554_v36 = vpop.f32.mrb[34].mxu1  ;;  %v3465_v32 = vld [vmem:[#allocation6 + $0x100] ss:$8 sps:$4 sm:$0xff]  }
 0x4df   :  { %v1603_v37 = vadd.f32 %v1594_v28, %v1554_v36  ;;  %v1556_v38 = vpop.f32.mrb[35].mxu1  ;;  %v1617_v21 = vmax.f32 %v1601_v31, 0.0  ;;  %v3467_v31 = vld [vmem:[#allocation6 + $0x104] ss:$8 sps:$4 sm:$0xff]   ;;  %v3471_v36 = vld [vmem:[#allocation6 + $0x120] ss:$8 sps:$4 sm:$0xff]  }
 0x4e0   :  { %v1604_v4 = vadd.f32 %v1598_v29, %v1556_v38  ;;  %v1618_v40 = vmax.f32 %v1602_v33, 0.0  ;;  %v3473_v33 = vld [vmem:[#allocation6 + $0x124] ss:$8 sps:$4 sm:$0xff]   ;;  %v3474_v38 = vld [vmem:[#allocation6 + $0x130] ss:$8 sps:$4 sm:$0xff]  }
 0x4e1   :  { %v1619_v39 = vmax.f32 %v1603_v37, 0.0  ;;  %v3476_v37 = vld [vmem:[#allocation6 + $0x134] ss:$8 sps:$4 sm:$0xff]  }
 0x4e2   :  { %v1620_v20 = vmax.f32 %v1604_v4, 0.0  ;;  %v3479_v4 = vld [vmem:[#allocation6 + $0x144] ss:$8 sps:$4 sm:$0xff]  }
 0x4e3   :  { %v4104_v35 = vpack.c.bf16 %v1619_v39, %v1617_v21  ;;  %v3482_v21 = vld [vmem:[#allocation6 + $0x154] ss:$8 sps:$4 sm:$0xff]   ;;  %v3480_v39 = vld [vmem:[#allocation6 + $0x150] ss:$8 sps:$4 sm:$0xff]  }
 0x4e4   :  { %v4106_v41 = vpack.c.bf16 %v1620_v20, %v1618_v40  ;;  %v1560_v42 = vpop.f32.mrb[36].mxu1  ;;  %v3485_v40 = vld [vmem:[#allocation6 + $0x164] ss:$8 sps:$4 sm:$0xff]   ;;  %v3488_v20 = vld [vmem:[#allocation6 + $0x174] ss:$8 sps:$4 sm:$0xff]  }
 0x4e5   :  { %v1605_v43 = vadd.f32 %v1594_v28, %v1560_v42  ;;  %v1562_v34 = vpop.f32.mrb[37].mxu1  ;;  %v3486_v42 = vld [vmem:[#allocation6 + $0x170] ss:$8 sps:$4 sm:$0xff]  }
 0x4e6   :  { %v1606_v44 = vadd.f32 %v1598_v29, %v1562_v34  ;;  %v1564_v45 = vpop.f32.mrb[38].mxu1  ;;  %1641 = vmatprep.subr.bf16.mxu0 %v4106_v41  ;;  %v3494_v34 = vld [vmem:[#allocation6 + $0x194] ss:$8 sps:$4 sm:$0xff]  }
 0x4e7   :  { %v1607_v46 = vadd.f32 %v1594_v28, %v1564_v45  ;;  %v1566_v47 = vpop.f32.mrb[39].mxu1  ;;  %1642 = vmatpush1.bf16.msra.mxu0 %v4104_v35  ;;  %v1621_v48 = vmax.f32 %v1605_v43, 0.0  ;;  %v3491_v43 = vld [vmem:[#allocation6 + $0x184] ss:$8 sps:$4 sm:$0xff]   ;;  %v3495_v45 = vld [vmem:[#allocation6 + $0x1a0] ss:$8 sps:$4 sm:$0xff]  }
 0x4e8   :  { %v1608_v51 = vadd.f32 %v1598_v29, %v1566_v47  ;;  %v1622_v57 = vmax.f32 %v1606_v44, 0.0  ;;  %v3497_v44 = vld [vmem:[#allocation6 + $0x1a4] ss:$8 sps:$4 sm:$0xff]  }
 0x4e9   :  { %v1623_v53 = vmax.f32 %v1607_v46, 0.0  ;;  %v3500_v46 = vld [vmem:[#allocation6 + $0x1b4] ss:$8 sps:$4 sm:$0xff]   ;;  %v3503_v47 = vld [vmem:[#allocation6 + $0x1c4] ss:$8 sps:$4 sm:$0xff]  }
 0x4ea   :  { %v1624_v49 = vmax.f32 %v1608_v51, 0.0  ;;  %v3506_v51 = vld [vmem:[#allocation6 + $0x1d4] ss:$8 sps:$4 sm:$0xff]  }
 0x4eb   :  { %v4110_v50 = vpack.c.bf16 %v1623_v53, %v1621_v48  ;;  %v3504_v48 = vld [vmem:[#allocation6 + $0x1d0] ss:$8 sps:$4 sm:$0xff]   ;;  %v3509_v53 = vld [vmem:[#allocation6 + $0x1e4] ss:$8 sps:$4 sm:$0xff]  }
 0x4ec   :  { %v4112_v58 = vpack.c.bf16 %v1624_v49, %v1622_v57  ;;  %v1570_v59 = vpop.f32.mrb[40].mxu1  ;;  %v3507_v57 = vld [vmem:[#allocation6 + $0x1e0] ss:$8 sps:$4 sm:$0xff]   ;;  %v3512_v49 = vld [vmem:[#allocation6 + $0x1f4] ss:$8 sps:$4 sm:$0xff]  }
 0x4ed   :  { %v1609_v60 = vadd.f32 %v1594_v28, %v1570_v59  ;;  %v1572_v61 = vpop.f32.mrb[41].mxu1  ;;  %v3510_v59 = vld [vmem:[#allocation6 + $0x1f0] ss:$8 sps:$4 sm:$0xff]  }
 0x4ee   :  { %v1610_v62 = vadd.f32 %v1598_v29, %v1572_v61  ;;  %v1574_v63 = vpop.f32.mrb[42].mxu1  ;;  %1643 = vmatprep.subr.bf16.mxu0 %v4112_v58  ;;  %v3513_v61 = vld [vmem:[#allocation6] ss:$8 sps:$4 sm:$0xff]  }
 0x4ef   :  { %v1611_v1 = vadd.f32 %v1594_v28, %v1574_v63  ;;  %v1576_v2 = vpop.f32.mrb[43].mxu1  ;;  %1644 = vmatpush1.bf16.msra.mxu0 %v4110_v50  ;;  %v1625_v5 = vmax.f32 %v1609_v60, 0.0  ;;  %v3515_v60 = vld [vmem:[#allocation6 + $0x4] ss:$8 sps:$4 sm:$0xff]   ;;  %v3516_v63 = vld [vmem:[#allocation6 + $0x10] ss:$8 sps:$4 sm:$0xff]  }
 0x4f0   :  { %v1612_v3 = vadd.f32 %v1598_v29, %v1576_v2  ;;  %v1626_v7 = vmax.f32 %v1610_v62, 0.0  ;;  %v3518_v62 = vld [vmem:[#allocation6 + $0x14] ss:$8 sps:$4 sm:$0xff]   ;;  %v3519_v2 = vld [vmem:[#allocation6 + $0x20] ss:$8 sps:$4 sm:$0xff]  }
 0x4f1   :  { %v1627_v6 = vmax.f32 %v1611_v1, 0.0  ;;  %v3521_v1 = vld [vmem:[#allocation6 + $0x24] ss:$8 sps:$4 sm:$0xff]  }
 0x4f2   :  { %v1628_v9 = vmax.f32 %v1612_v3, 0.0  ;;  %v3524_v3 = vld [vmem:[#allocation6 + $0x34] ss:$8 sps:$4 sm:$0xff]  }
 0x4f3   :  { %v4116_v10 = vpack.c.bf16 %v1627_v6, %v1625_v5  ;;  %v3522_v5 = vld [vmem:[#allocation6 + $0x30] ss:$8 sps:$4 sm:$0xff]   ;;  %v3527_v6 = vld [vmem:[#allocation6 + $0x44] ss:$8 sps:$4 sm:$0xff]  }
 0x4f4   :  { %v4118_v11 = vpack.c.bf16 %v1628_v9, %v1626_v7  ;;  %v1580_v12 = vpop.f32.mrb[44].mxu1  ;;  %v3528_v7 = vld [vmem:[#allocation6 + $0x50] ss:$8 sps:$4 sm:$0xff]   ;;  %v3533_v9 = vld [vmem:[#allocation6 + $0x64] ss:$8 sps:$4 sm:$0xff]  }
 0x4f5   :  { %v1613_v14 = vadd.f32 %v1594_v28, %v1580_v12  ;;  %v1582_v15 = vpop.f32.mrb[45].mxu1  ;;  %v3534_v12 = vld [vmem:[#allocation6 + $0x70] ss:$8 sps:$4 sm:$0xff]  }
 0x4f6   :  { %v1614_v16 = vadd.f32 %v1598_v29, %v1582_v15  ;;  %v1584_v17 = vpop.f32.mrb[46].mxu1  ;;  %1645 = vmatprep.subr.bf16.mxu0 %v4118_v11  ;;  %v3537_v15 = vld [vmem:[#allocation6 + $0x80] ss:$8 sps:$4 sm:$0xff]  }
 0x4f7   :  { %v1615_v19 = vadd.f32 %v1594_v28, %v1584_v17  ;;  %v1586_v56 = vpop.f32.mrb[47].mxu1  ;;  %1646 = vmatpush1.bf16.msra.mxu0 %v4116_v10  ;;  %v1629_v23 = vmax.f32 %v1613_v14, 0.0  ;;  %v3470_v28 = vld [vmem:[#allocation6 + $0x114] ss:$8 sps:$4 sm:$0xff]   ;;  %v3539_v14 = vld [vmem:[#allocation6 + $0x84] ss:$8 sps:$4 sm:$0xff]  }
 0x4f8   :  { %v1616_v22 = vadd.f32 %v1598_v29, %v1586_v56  ;;  %v1630_v25 = vmax.f32 %v1614_v16, 0.0  ;;  %v3468_v29 = vld [vmem:[#allocation6 + $0x110] ss:$8 sps:$4 sm:$0xff]   ;;  %v3545_v17 = vld [vmem:[#allocation6 + $0xa4] ss:$8 sps:$4 sm:$0xff]  }
 0x4f9   :  { %v1631_v24 = vmax.f32 %v1615_v19, 0.0  ;;  %v3540_v16 = vld [vmem:[#allocation6 + $0x90] ss:$8 sps:$4 sm:$0xff]   ;;  %v3543_v19 = vld [vmem:[#allocation6 + $0xa0] ss:$8 sps:$4 sm:$0xff]  }
 0x4fa   :  { %v1632_v26 = vmax.f32 %v1616_v22, 0.0  ;;  %v3548_v56 = vld [vmem:[#allocation6 + $0xb4] ss:$8 sps:$4 sm:$0xff]   ;;  %v3546_v22 = vld [vmem:[#allocation6 + $0xb0] ss:$8 sps:$4 sm:$0xff]  }
 0x4fb   :  { %v4122_v27 = vpack.c.bf16 %v1631_v24, %v1629_v23  ;;  %v3551_v23 = vld [vmem:[#allocation6 + $0xc4] ss:$8 sps:$4 sm:$0xff]   ;;  %v3549_v24 = vld [vmem:[#allocation6 + $0xc0] ss:$8 sps:$4 sm:$0xff]  }
 0x4fc   :  { %v4124_v30 = vpack.c.bf16 %v1632_v26, %v1630_v25  ;;  %v3554_v25 = vld [vmem:[#allocation6 + $0xd4] ss:$8 sps:$4 sm:$0xff]   ;;  %v3552_v26 = vld [vmem:[#allocation6 + $0xd0] ss:$8 sps:$4 sm:$0xff]  }
 0x4fe   :  { %1647 = vmatprep.subr.bf16.mxu0 %v4124_v30 }
 0x4ff   :  { %1648 = vmatpush1.bf16.msra.mxu0 %v4122_v27 }
 0x500   :  { %1946 = vmatprep.subr.bf16.mxu0 %v3467_v31  ;;  %v3563_v31 = vld [vmem:[#allocation7 + $0x4] ss:$8 sps:$4 sm:$0xff]  }
 0x501   :  { %2508 = vmatprep.subr.bf16.mxu1 %v3563_v31 }
 0x502   :  { %3048 = vmatmul.mubr.msk.bf16.vlgmr.msra.gmra.mrb[32].mxu0 %vm302_vm1, %v4021_v55  ;;  %v3477_v55 = vld [vmem:[#allocation6 + $0x140] ss:$8 sps:$4 sm:$0xff]  }
 0x503   :  { %1947 = vmatpush1.bf16.msra.mxu0 %v3465_v32  ;;  %1683 = vmatprep.mubr.bf16.mxu0 %v3782_v0  ;;  %v3566_v32 = vld [vmem:[#allocation7 + $0x14] ss:$8 sps:$4 sm:$0xff]  }
 0x504   :  { %1948 = vmatprep.subr.bf16.mxu0 %v3470_v28  ;;  %v3555_v28 = vld [vmem:[#allocation6 + $0xe0] ss:$8 sps:$4 sm:$0xff]  }
 0x507   :  { %1949 = vmatpush1.bf16.msra.mxu0 %v3468_v29  ;;  %v3564_v29 = vld [vmem:[#allocation7 + $0x10] ss:$8 sps:$4 sm:$0xff]  }
 0x508   :  { %1950 = vmatprep.subr.bf16.mxu0 %v3473_v33  ;;  %v3560_v33 = vld [vmem:[#allocation6 + $0xf4] ss:$8 sps:$4 sm:$0xff]  }
 0x50a   :  { %3049 = vmatmul.mubr.msk.bf16.gmra.mrb[36].mxu0 %vm302_vm1, %v4029_v8  ;;  %v3483_v8 = vld [vmem:[#allocation6 + $0x160] ss:$8 sps:$4 sm:$0xff]  }
 0x50b   :  { %1951 = vmatpush1.bf16.msra.mxu0 %v3471_v36  ;;  %1693 = vmatprep.mubr.bf16.mxu0 %v3782_v0  ;;  %v3569_v36 = vld [vmem:[#allocation7 + $0x24] ss:$8 sps:$4 sm:$0xff]  }
 0x50c   :  { %1952 = vmatprep.subr.bf16.mxu0 %v3476_v37  ;;  %v3558_v37 = vld [vmem:[#allocation6 + $0xf0] ss:$8 sps:$4 sm:$0xff]  }
 0x50f   :  { %1953 = vmatpush1.bf16.msra.mxu0 %v3474_v38  ;;  %v3567_v38 = vld [vmem:[#allocation7 + $0x20] ss:$8 sps:$4 sm:$0xff]  }
 0x510   :  { %1954 = vmatprep.subr.bf16.mxu0 %v3479_v4  ;;  %v3572_v4 = vld [vmem:[#allocation7 + $0x34] ss:$8 sps:$4 sm:$0xff]  }
 0x512   :  { %3050 = vmatmul.mubr.msk.bf16.gmra.mrb[40].mxu0 %vm302_vm1, %v4037_v13  ;;  %v3489_v13 = vld [vmem:[#allocation6 + $0x180] ss:$8 sps:$4 sm:$0xff]  }
 0x513   :  { %1955 = vmatpush1.bf16.msra.mxu0 %v3477_v55  ;;  %1703 = vmatprep.mubr.bf16.mxu0 %v3782_v0  ;;  %v3492_v0 = vld [vmem:[#allocation6 + $0x190] ss:$8 sps:$4 sm:$0xff]  }
 0x514   :  { %1956 = vmatprep.subr.bf16.mxu0 %v3482_v21  ;;  %v3570_v55 = vld [vmem:[#allocation7 + $0x30] ss:$8 sps:$4 sm:$0xff]   ;;  %v3575_v21 = vld [vmem:[#allocation7 + $0x44] ss:$8 sps:$4 sm:$0xff]  }
 0x517   :  { %1957 = vmatpush1.bf16.msra.mxu0 %v3480_v39  ;;  %v3573_v39 = vld [vmem:[#allocation7 + $0x40] ss:$8 sps:$4 sm:$0xff]  }
 0x518   :  { %1958 = vmatprep.subr.bf16.mxu0 %v3485_v40  ;;  %v3578_v40 = vld [vmem:[#allocation7 + $0x54] ss:$8 sps:$4 sm:$0xff]  }
 0x51a   :  { %3051 = vmatmul.mubr.msk.bf16.gmra.mrb[44].mxu0 %vm302_vm1, %v4045_v18  ;;  %v3498_v18 = vld [vmem:[#allocation6 + $0x1b0] ss:$8 sps:$4 sm:$0xff]  }
 0x51b   :  { %1959 = vmatpush1.bf16.msra.mxu0 %v3483_v8  ;;  %1978 = vmatprep.mubr.bf16.mxu0 %v4106_v41  ;;  %v3501_v41 = vld [vmem:[#allocation6 + $0x1c0] ss:$8 sps:$4 sm:$0xff]   ;;  %v3576_v8 = vld [vmem:[#allocation7 + $0x50] ss:$8 sps:$4 sm:$0xff]  }
 0x51c   :  { %1960 = vmatprep.subr.bf16.mxu0 %v3488_v20  ;;  %v3581_v20 = vld [vmem:[#allocation7 + $0x64] ss:$8 sps:$4 sm:$0xff]  }
 0x51f   :  { %1961 = vmatpush1.bf16.msra.mxu0 %v3486_v42  ;;  %v3579_v42 = vld [vmem:[#allocation7 + $0x60] ss:$8 sps:$4 sm:$0xff]  }
 0x520   :  { %1962 = vmatprep.subr.bf16.mxu0 %v3491_v43  ;;  %v3584_v43 = vld [vmem:[#allocation7 + $0x74] ss:$8 sps:$4 sm:$0xff]  }
 0x523   :  { %1963 = vmatpush1.bf16.msra.mxu0 %v3489_v13  ;;  %v3582_v13 = vld [vmem:[#allocation7 + $0x70] ss:$8 sps:$4 sm:$0xff]  }
 0x524   :  { %1964 = vmatprep.subr.bf16.mxu0 %v3494_v34  ;;  %v3587_v34 = vld [vmem:[#allocation7 + $0x84] ss:$8 sps:$4 sm:$0xff]  }
 0x527   :  { %1965 = vmatpush1.bf16.msra.mxu0 %v3492_v0  ;;  %v3585_v0 = vld [vmem:[#allocation7 + $0x80] ss:$8 sps:$4 sm:$0xff]  }
 0x528   :  { %1966 = vmatprep.subr.bf16.mxu0 %v3497_v44  ;;  %v3590_v44 = vld [vmem:[#allocation7 + $0x94] ss:$8 sps:$4 sm:$0xff]  }
 0x52b   :  { %1967 = vmatpush1.bf16.msra.mxu0 %v3495_v45  ;;  %v3588_v45 = vld [vmem:[#allocation7 + $0x90] ss:$8 sps:$4 sm:$0xff]  }
 0x52c   :  { %1968 = vmatprep.subr.bf16.mxu0 %v3500_v46  ;;  %v3593_v46 = vld [vmem:[#allocation7 + $0xa4] ss:$8 sps:$4 sm:$0xff]  }
 0x52f   :  { %1969 = vmatpush1.bf16.msra.mxu0 %v3498_v18  ;;  %v3591_v18 = vld [vmem:[#allocation7 + $0xa0] ss:$8 sps:$4 sm:$0xff]  }
 0x530   :  { %1970 = vmatprep.subr.bf16.mxu0 %v3503_v47  ;;  %v3596_v47 = vld [vmem:[#allocation7 + $0xb4] ss:$8 sps:$4 sm:$0xff]  }
 0x533   :  { %1971 = vmatpush1.bf16.msra.mxu0 %v3501_v41  ;;  %v3594_v41 = vld [vmem:[#allocation7 + $0xb0] ss:$8 sps:$4 sm:$0xff]  }
 0x534   :  { %1972 = vmatprep.subr.bf16.mxu0 %v3506_v51  ;;  %v3599_v51 = vld [vmem:[#allocation7 + $0xc4] ss:$8 sps:$4 sm:$0xff]  }
 0x537   :  { %1973 = vmatpush1.bf16.msra.mxu0 %v3504_v48  ;;  %v3597_v48 = vld [vmem:[#allocation7 + $0xc0] ss:$8 sps:$4 sm:$0xff]  }
 0x538   :  { %1974 = vmatprep.subr.bf16.mxu0 %v3509_v53  ;;  %v3602_v53 = vld [vmem:[#allocation7 + $0xd4] ss:$8 sps:$4 sm:$0xff]  }
 0x53b   :  { %1975 = vmatpush1.bf16.msra.mxu0 %v3507_v57  ;;  %v3600_v57 = vld [vmem:[#allocation7 + $0xd0] ss:$8 sps:$4 sm:$0xff]  }
 0x53c   :  { %1976 = vmatprep.subr.bf16.mxu0 %v3512_v49 }
 0x53f   :  { %1977 = vmatpush1.bf16.msra.mxu0 %v3510_v59 }
 0x540   :  { %2179 = vmatprep.subr.bf16.mxu0 %v3515_v60 }
 0x542   :  { %1979 = vmatmul.mubr.bf16.vlgmr.msra.gmra.mrb[48].mxu0 %v4104_v35  ;;  %v3525_v35 = vld [vmem:[#allocation6 + $0x40] ss:$8 sps:$4 sm:$0xff]  }
 0x543   :  { %1988 = vmatprep.mubr.bf16.mxu0 %v4112_v58  ;;  %2180 = vmatpush1.bf16.msra.mxu0 %v3513_v61  ;;  %v3530_v58 = vld [vmem:[#allocation6 + $0x54] ss:$8 sps:$4 sm:$0xff]  }
 0x544   :  { %2181 = vmatprep.subr.bf16.mxu0 %v3518_v62 }
 0x547   :  { %2182 = vmatpush1.bf16.msra.mxu0 %v3516_v63 }
 0x548   :  { %2183 = vmatprep.subr.bf16.mxu0 %v3521_v1 }
 0x54a   :  { %1989 = vmatmul.mubr.bf16.gmra.mrb[52].mxu0 %v4110_v50  ;;  %v3531_v50 = vld [vmem:[#allocation6 + $0x60] ss:$8 sps:$4 sm:$0xff]  }
 0x54b   :  { %1998 = vmatprep.mubr.bf16.mxu0 %v4118_v11  ;;  %2184 = vmatpush1.bf16.msra.mxu0 %v3519_v2  ;;  %v3536_v11 = vld [vmem:[#allocation6 + $0x74] ss:$8 sps:$4 sm:$0xff]  }
 0x54c   :  { %2185 = vmatprep.subr.bf16.mxu0 %v3524_v3 }
 0x54f   :  { %2186 = vmatpush1.bf16.msra.mxu0 %v3522_v5 }
 0x550   :  { %2187 = vmatprep.subr.bf16.mxu0 %v3527_v6 }
 0x552   :  { %1999 = vmatmul.mubr.bf16.gmra.mrb[56].mxu0 %v4116_v10  ;;  %v3542_v10 = vld [vmem:[#allocation6 + $0x94] ss:$8 sps:$4 sm:$0xff]  }
 0x553   :  { %2008 = vmatprep.mubr.bf16.mxu0 %v4124_v30  ;;  %2188 = vmatpush1.bf16.msra.mxu0 %v3525_v35  ;;  %v3561_v30 = vld [vmem:[#allocation7] ss:$8 sps:$4 sm:$0xff]  }
 0x554   :  { %2189 = vmatprep.subr.bf16.mxu0 %v3530_v58  ;;  %2509 = vmatpush1.bf16.msra.mxu1 %v3561_v30 }
 0x555   :  { %2510 = vmatprep.subr.bf16.mxu1 %v3566_v32 }
 0x557   :  { %2190 = vmatpush1.bf16.msra.mxu0 %v3528_v7 }
 0x558   :  { %2191 = vmatprep.subr.bf16.mxu0 %v3533_v9  ;;  %2511 = vmatpush1.bf16.msra.mxu1 %v3564_v29 }
 0x559   :  { %2512 = vmatprep.subr.bf16.mxu1 %v3569_v36 }
 0x55a   :  { %2009 = vmatmul.mubr.bf16.gmra.mrb[60].mxu0 %v4122_v27  ;;  %v3557_v27 = vld [vmem:[#allocation6 + $0xe4] ss:$8 sps:$4 sm:$0xff]  }
 0x55b   :  { %2192 = vmatpush1.bf16.msra.mxu0 %v3531_v50 }
 0x55c   :  { %2193 = vmatprep.subr.bf16.mxu0 %v3536_v11  ;;  %2513 = vmatpush1.bf16.msra.mxu1 %v3567_v38 }
 0x55d   :  { %2514 = vmatprep.subr.bf16.mxu1 %v3572_v4 }
 0x55f   :  { %2194 = vmatpush1.bf16.msra.mxu0 %v3534_v12 }
 0x560   :  { %2195 = vmatprep.subr.bf16.mxu0 %v3539_v14  ;;  %2515 = vmatpush1.bf16.msra.mxu1 %v3570_v55 }
 0x561   :  { %2516 = vmatprep.subr.bf16.mxu1 %v3575_v21 }
 0x563   :  { %2196 = vmatpush1.bf16.msra.mxu0 %v3537_v15 }
 0x564   :  { %2197 = vmatprep.subr.bf16.mxu0 %v3542_v10  ;;  %2517 = vmatpush1.bf16.msra.mxu1 %v3573_v39 }
 0x565   :  { %2518 = vmatprep.subr.bf16.mxu1 %v3578_v40 }
 0x567   :  { %2198 = vmatpush1.bf16.msra.mxu0 %v3540_v16 }
 0x568   :  { %2199 = vmatprep.subr.bf16.mxu0 %v3545_v17  ;;  %2519 = vmatpush1.bf16.msra.mxu1 %v3576_v8 }
 0x569   :  { %2520 = vmatprep.subr.bf16.mxu1 %v3581_v20 }
 0x56b   :  { %2200 = vmatpush1.bf16.msra.mxu0 %v3543_v19 }
 0x56c   :  { %2201 = vmatprep.subr.bf16.mxu0 %v3548_v56  ;;  %2521 = vmatpush1.bf16.msra.mxu1 %v3579_v42  ;;  %v3605_v56 = vld [vmem:[#allocation7 + $0xe4] ss:$8 sps:$4 sm:$0xff]  }
 0x56d   :  { %2522 = vmatprep.subr.bf16.mxu1 %v3584_v43  ;;  %v3610_v42 = vld [vmem:[#allocation9] sm:$0xff]  }
 0x56f   :  { %2202 = vmatpush1.bf16.msra.mxu0 %v3546_v22  ;;  %v3603_v22 = vld [vmem:[#allocation7 + $0xe0] ss:$8 sps:$4 sm:$0xff]  }
 0x570   :  { %2203 = vmatprep.subr.bf16.mxu0 %v3551_v23  ;;  %2523 = vmatpush1.bf16.msra.mxu1 %v3582_v13  ;;  %v3608_v23 = vld [vmem:[#allocation7 + $0xf4] ss:$8 sps:$4 sm:$0xff]  }
 0x571   :  { %2524 = vmatprep.subr.bf16.mxu1 %v3587_v34  ;;  %v3611_v34 = vld [vmem:[#allocation9 + $0x48] sm:$0xff]  }
 0x573   :  { %2204 = vmatpush1.bf16.msra.mxu0 %v3549_v24  ;;  %v3606_v24 = vld [vmem:[#allocation7 + $0xf0] ss:$8 sps:$4 sm:$0xff]  }
 0x574   :  { %2205 = vmatprep.subr.bf16.mxu0 %v3554_v25  ;;  %2525 = vmatpush1.bf16.msra.mxu1 %v3585_v0  ;;  %v3609_v25 = vld [vmem:[#allocation9 + $0x40] sm:$0xff]  }
 0x575   :  { %2526 = vmatprep.subr.bf16.mxu1 %v3590_v44 }
 0x577   :  { %2206 = vmatpush1.bf16.msra.mxu0 %v3552_v26  ;;  %v2252_v26 = vld [vmem:[%s4233_s9] sm:$0x3] }
 0x578   :  { %2207 = vmatprep.subr.bf16.mxu0 %v3557_v27  ;;  %2527 = vmatpush1.bf16.msra.mxu1 %v3588_v45  ;;  %v4151_v27 = vrot.slane %v2252_v26, %v3989_v52  ;;  %v4154_v30 = vrot.slane %v2252_v26, %v3994_v54 }
 0x579   :  { %2528 = vmatprep.subr.bf16.mxu1 %v3593_v46 }
 0x57b   :  { %2208 = vmatpush1.bf16.msra.mxu0 %v3555_v28 }
 0x57c   :  { %2209 = vmatprep.subr.bf16.mxu0 %v3560_v33  ;;  %2529 = vmatpush1.bf16.msra.mxu1 %v3591_v18 }
 0x57d   :  { %2530 = vmatprep.subr.bf16.mxu1 %v3596_v47  ;;  %v3612_v47 = vld [vmem:[#allocation9 + $0x8] sm:$0xff]  }
 0x57f   :  { %2210 = vmatpush1.bf16.msra.mxu0 %v3558_v37 }
 0x580   :  { %2531 = vmatpush1.bf16.msra.mxu1 %v3594_v41 }
 0x581   :  { %2532 = vmatprep.subr.bf16.mxu1 %v3599_v51 }
 0x584   :  { %2533 = vmatpush1.bf16.msra.mxu1 %v3597_v48  ;;  %v3613_v48 = vld [vmem:[#allocation9 + $0x50] sm:$0xff]  }
 0x585   :  { %2534 = vmatprep.subr.bf16.mxu1 %v3602_v53 }
 0x588   :  { %2535 = vmatpush1.bf16.msra.mxu1 %v3600_v57 }
 0x589   :  { %2536 = vmatprep.subr.bf16.mxu1 %v3605_v56  ;;  %v3619_v56 = vld [vmem:[#allocation9 + $0x68] sm:$0xff]  }
 0x58c   :  { %2537 = vmatpush1.bf16.msra.mxu1 %v3603_v22 }
 0x58d   :  { %2538 = vmatprep.subr.bf16.mxu1 %v3608_v23 }
 0x590   :  { %2539 = vmatpush1.bf16.msra.mxu1 %v3606_v24 }
 0x591   :  { %3165 = vmatprep.subr.bf16.mxu1 %v3609_v25 }
 0x5d5   :  { %v1675_v49 = vpop.f32.mrb[32].mxu0 }
 0x5d6   :  { %v1677_v59 = vpop.f32.mrb[33].mxu0 }
 0x5d7   :  { %v1679_v60 = vpop.f32.mrb[34].mxu0 }
 0x5d8   :  { %v1714_v61 = vpack.c.bf16 %v1679_v60, %v1675_v49  ;;  %v1681_v62 = vpop.f32.mrb[35].mxu0 }
 0x5d9   :  { %v1715_v63 = vpack.c.bf16 %v1681_v62, %v1677_v59 }
 0x5db   :  { %2211 = vmatprep.mubr.bf16.mxu0 %v1715_v63 }
 0x5dc   :  { %2212 = vmatmul.mubr.bf16.vlgmr.msra.gmra.mrb[48].mxu0 %v1714_v61  ;;  %v3614_v61 = vld [vmem:[#allocation9 + $0x10] sm:$0xff]  }
 0x5dd   :  { %v1685_v1 = vpop.f32.mrb[36].mxu0 }
 0x5de   :  { %v1687_v2 = vpop.f32.mrb[37].mxu0 }
 0x5df   :  { %v1689_v3 = vpop.f32.mrb[38].mxu0 }
 0x5e0   :  { %v1716_v5 = vpack.c.bf16 %v1689_v3, %v1685_v1  ;;  %v1691_v6 = vpop.f32.mrb[39].mxu0  ;;  %v3615_v1 = vld [vmem:[#allocation9 + $0x58] sm:$0xff]  }
 0x5e1   :  { %v1717_v35 = vpack.c.bf16 %v1691_v6, %v1687_v2 }
 0x5e3   :  { %2221 = vmatprep.mubr.bf16.mxu0 %v1717_v35 }
 0x5e4   :  { %2222 = vmatmul.mubr.bf16.gmra.mrb[52].mxu0 %v1716_v5 }
 0x5e5   :  { %v1695_v58 = vpop.f32.mrb[40].mxu0 }
 0x5e6   :  { %v1697_v7 = vpop.f32.mrb[41].mxu0 }
 0x5e7   :  { %v1699_v9 = vpop.f32.mrb[42].mxu0 }
 0x5e8   :  { %v1718_v50 = vpack.c.bf16 %v1699_v9, %v1695_v58  ;;  %v1701_v11 = vpop.f32.mrb[43].mxu0  ;;  %v3616_v58 = vld [vmem:[#allocation9 + $0x18] sm:$0xff]  }
 0x5e9   :  { %v1719_v12 = vpack.c.bf16 %v1701_v11, %v1697_v7 }
 0x5eb   :  { %2231 = vmatprep.mubr.bf16.mxu0 %v1719_v12 }
 0x5ec   :  { %2232 = vmatmul.mubr.bf16.gmra.mrb[56].mxu0 %v1718_v50  ;;  %v3617_v50 = vld [vmem:[#allocation9 + $0x60] sm:$0xff]  }
 0x5ed   :  { %v1705_v14 = vpop.f32.mrb[44].mxu0 }
 0x5ee   :  { %v1707_v15 = vpop.f32.mrb[45].mxu0 }
 0x5ef   :  { %v1709_v10 = vpop.f32.mrb[46].mxu0 }
 0x5f0   :  { %v1720_v16 = vpack.c.bf16 %v1709_v10, %v1705_v14  ;;  %v1711_v17 = vpop.f32.mrb[47].mxu0 }
 0x5f1   :  { %v1721_v19 = vpack.c.bf16 %v1711_v17, %v1707_v15 }
 0x5f3   :  { %2241 = vmatprep.mubr.bf16.mxu0 %v1721_v19 }
 0x5f4   :  { %2242 = vmatmul.mubr.bf16.gmra.mrb[60].mxu0 %v1720_v16  ;;  %v3618_v16 = vld [vmem:[#allocation9 + $0x20] sm:$0xff]  }
 0x6af   :  { %v2213_v31 = vpop.f32.mrb[48].mxu0 }
 0x6b0   :  { %v2264_v32 = vadd.f32 %v4151_v27, %v2213_v31  ;;  %v2215_v28 = vpop.f32.mrb[49].mxu0 }
 0x6b1   :  { %v2265_v29 = vadd.f32 %v4154_v30, %v2215_v28  ;;  %v2217_v33 = vpop.f32.mrb[50].mxu0 }
 0x6b2   :  { %v2266_v36 = vadd.f32 %v4151_v27, %v2217_v33  ;;  %v2219_v37 = vpop.f32.mrb[51].mxu0  ;;  %v2280_v4 = vmax.f32 %v2264_v32, 0.0 }
 0x6b3   :  { %v2267_v38 = vadd.f32 %v4154_v30, %v2219_v37  ;;  %v2281_v21 = vmax.f32 %v2265_v29, 0.0  ;;  %v3620_v37 = vld [vmem:[#allocation9 + $0x28] sm:$0xff]  }
 0x6b4   :  { %v2282_v55 = vmax.f32 %v2266_v36, 0.0 }
 0x6b5   :  { %v2283_v39 = vmax.f32 %v2267_v38, 0.0  ;;  %v3621_v38 = vld [vmem:[#allocation9 + $0x70] sm:$0xff]  }
 0x6b6   :  { %v2296_v40 = vpack.c.bf16 %v2282_v55, %v2280_v4  ;;  %v3622_v4 = vld [vmem:[#allocation9 + $0x30] sm:$0xff]   ;;  %v3624_v55 = vld [vmem:[#allocation9 + $0x38] sm:$0xff]  }
 0x6b7   :  { %v2297_v8 = vpack.c.bf16 %v2283_v39, %v2281_v21  ;;  %v2223_v20 = vpop.f32.mrb[52].mxu0 }
 0x6b8   :  { %v2268_v43 = vadd.f32 %v4151_v27, %v2223_v20  ;;  %v2225_v13 = vpop.f32.mrb[53].mxu0 }
 0x6b9   :  { %v2269_v0 = vadd.f32 %v4154_v30, %v2225_v13  ;;  %v2227_v44 = vpop.f32.mrb[54].mxu0  ;;  %2540 = vmatprep.mubr.bf16.mxu1 %v2297_v8 }
 0x6ba   :  { %v2270_v45 = vadd.f32 %v4151_v27, %v2227_v44  ;;  %v2229_v46 = vpop.f32.mrb[55].mxu0  ;;  %2541 = vmatmul.mubr.bf16.vlgmr.msra.gmra.mrb[48].mxu1 %v2296_v40  ;;  %v2284_v41 = vmax.f32 %v2268_v43, 0.0 }
 0x6bb   :  { %v2271_v18 = vadd.f32 %v4154_v30, %v2229_v46  ;;  %3166 = vmatpush3.bf16.msra.mxu1 %v3610_v42  ;;  %v2285_v53 = vmax.f32 %v2269_v0, 0.0 }
 0x6bc   :  { %v2286_v51 = vmax.f32 %v2270_v45, 0.0  ;;  %3167 = vmatprep.subr.bf16.mxu1 %v3611_v34 }
 0x6bd   :  { %v2287_v57 = vmax.f32 %v2271_v18, 0.0 }
 0x6be   :  { %v2298_v49 = vpack.c.bf16 %v2286_v51, %v2284_v41 }
 0x6bf   :  { %v2299_v59 = vpack.c.bf16 %v2287_v57, %v2285_v53  ;;  %v2233_v60 = vpop.f32.mrb[56].mxu0  ;;  %3168 = vmatpush3.bf16.msra.mxu1 %v3612_v47 }
 0x6c0   :  { %v2272_v62 = vadd.f32 %v4151_v27, %v2233_v60  ;;  %v2235_v63 = vpop.f32.mrb[57].mxu0  ;;  %3169 = vmatprep.subr.bf16.mxu1 %v3613_v48 }
 0x6c1   :  { %v2273_v2 = vadd.f32 %v4154_v30, %v2235_v63  ;;  %v2237_v3 = vpop.f32.mrb[58].mxu0  ;;  %2550 = vmatprep.mubr.bf16.mxu1 %v2299_v59 }
 0x6c2   :  { %v2274_v5 = vadd.f32 %v4151_v27, %v2237_v3  ;;  %v2239_v6 = vpop.f32.mrb[59].mxu0  ;;  %2551 = vmatmul.mubr.bf16.gmra.mrb[52].mxu1 %v2298_v49  ;;  %v2288_v7 = vmax.f32 %v2272_v62, 0.0 }
 0x6c3   :  { %v2275_v35 = vadd.f32 %v4154_v30, %v2239_v6  ;;  %3170 = vmatpush3.bf16.msra.mxu1 %v3614_v61  ;;  %v2289_v11 = vmax.f32 %v2273_v2, 0.0 }
 0x6c4   :  { %v2290_v9 = vmax.f32 %v2274_v5, 0.0  ;;  %3171 = vmatprep.subr.bf16.mxu1 %v3615_v1 }
 0x6c5   :  { %v2291_v12 = vmax.f32 %v2275_v35, 0.0 }
 0x6c6   :  { %v2300_v14 = vpack.c.bf16 %v2290_v9, %v2288_v7 }
 0x6c7   :  { %v2301_v15 = vpack.c.bf16 %v2291_v12, %v2289_v11  ;;  %v2243_v10 = vpop.f32.mrb[60].mxu0  ;;  %3172 = vmatpush3.bf16.msra.mxu1 %v3616_v58 }
 0x6c8   :  { %v2276_v17 = vadd.f32 %v4151_v27, %v2243_v10  ;;  %v2245_v19 = vpop.f32.mrb[61].mxu0  ;;  %3173 = vmatprep.subr.bf16.mxu1 %v3617_v50 }
 0x6c9   :  { %v2277_v22 = vadd.f32 %v4154_v30, %v2245_v19  ;;  %v2247_v23 = vpop.f32.mrb[62].mxu0  ;;  %2560 = vmatprep.mubr.bf16.mxu1 %v2301_v15 }
 0x6ca   :  { %v2278_v24 = vadd.f32 %v4151_v27, %v2247_v23  ;;  %v2249_v25 = vpop.f32.mrb[63].mxu0  ;;  %2561 = vmatmul.mubr.bf16.gmra.mrb[56].mxu1 %v2300_v14  ;;  %v2292_v31 = vmax.f32 %v2276_v17, 0.0  ;;  %v3623_v27 = vld [vmem:[#allocation9 + $0x78] sm:$0xff]  }
 0x6cb   :  { %v2279_v26 = vadd.f32 %v4154_v30, %v2249_v25  ;;  %3174 = vmatpush3.bf16.msra.mxu1 %v3618_v16  ;;  %v2293_v28 = vmax.f32 %v2277_v22, 0.0  ;;  %v2336_v30 = vld [vmem:[%s4235_s11] sm:$0x3] }
 0x6cc   :  { %v2294_v32 = vmax.f32 %v2278_v24, 0.0  ;;  %3175 = vmatprep.subr.bf16.mxu1 %v3619_v56  ;;  %v2341_v21 = vrot.slane %v2336_v30, %v3989_v52  ;;  %v2345_v39 = vrot.slane %v2336_v30, %v3994_v54 }
 0x6cd   :  { %v2295_v29 = vmax.f32 %v2279_v26, 0.0 }
 0x6ce   :  { %v2302_v33 = vpack.c.bf16 %v2294_v32, %v2292_v31 }
 0x6cf   :  { %v2303_v36 = vpack.c.bf16 %v2295_v29, %v2293_v28  ;;  %3176 = vmatpush3.bf16.msra.mxu1 %v3620_v37 }
 0x6d0   :  { %3177 = vmatprep.subr.bf16.mxu1 %v3621_v38 }
 0x6d1   :  { %2570 = vmatprep.mubr.bf16.mxu1 %v2303_v36 }
 0x6d2   :  { %2571 = vmatmul.mubr.bf16.gmra.mrb[60].mxu1 %v2302_v33 }
 0x6d3   :  { %3178 = vmatpush3.bf16.msra.mxu1 %v3622_v4  ;;  %v3148_v4 = vld [vmem:[%s4237_s13] ss:$0 sm:$0xff] }
 0x6d4   :  { %3179 = vmatprep.subr.bf16.mxu1 %v3623_v27 }
 0x6d7   :  { %3180 = vmatpush3.bf16.msra.mxu1 %v3624_v55 }
 0x78d   :  { %v2542_v40 = vpop.f32.mrb[48].mxu1 }
 0x78e   :  { %v2543_v8 = vadd.f32 %v2542_v40, %v2341_v21  ;;  %v2544_v20 = vpop.f32.mrb[49].mxu1 }
 0x78f   :  { %v2545_v42 = vadd.f32 %v2544_v20, %v2345_v39  ;;  %v2546_v43 = vpop.f32.mrb[50].mxu1 }
 0x790   :  { %v2547_v13 = vadd.f32 %v2546_v43, %v2341_v21  ;;  %v2548_v34 = vpop.f32.mrb[51].mxu1  ;;  %v2581_v44 = vmax.f32 %v2543_v8, 0.0 }
 0x791   :  { %v2549_v0 = vadd.f32 %v2548_v34, %v2345_v39  ;;  %v2582_v46 = vmax.f32 %v2545_v42, 0.0 }
 0x792   :  { %v2583_v45 = vmax.f32 %v2547_v13, 0.0 }
 0x793   :  { %v2584_v18 = vmax.f32 %v2549_v0, 0.0 }
 0x794   :  { %v2597_v47 = vpack.c.bf16 %v2583_v45, %v2581_v44 }
 0x795   :  { %v2598_v41 = vpack.c.bf16 %v2584_v18, %v2582_v46  ;;  %v2552_v51 = vpop.f32.mrb[52].mxu1 }
 0x796   :  { %v2553_v48 = vadd.f32 %v2552_v51, %v2341_v21  ;;  %v2554_v53 = vpop.f32.mrb[53].mxu1 }
 0x797   :  { %v2555_v52 = vadd.f32 %v2554_v53, %v2345_v39  ;;  %v2556_v57 = vpop.f32.mrb[54].mxu1  ;;  %2772 = vmatprep.mubr.bf16.mxu1 %v2598_v41 }
 0x798   :  { %v2557_v54 = vadd.f32 %v2556_v57, %v2341_v21  ;;  %v2558_v49 = vpop.f32.mrb[55].mxu1  ;;  %2773 = vmatmul.mubr.bf16.vlgmr.msra.gmra.mrb[64].mxu1 %v2597_v47  ;;  %v2585_v60 = vmax.f32 %v2553_v48, 0.0 }
 0x799   :  { %v2559_v59 = vadd.f32 %v2558_v49, %v2345_v39  ;;  %v2586_v62 = vmax.f32 %v2555_v52, 0.0 }
 0x79a   :  { %v2587_v61 = vmax.f32 %v2557_v54, 0.0 }
 0x79b   :  { %v2588_v63 = vmax.f32 %v2559_v59, 0.0 }
 0x79c   :  { %v2599_v1 = vpack.c.bf16 %v2587_v61, %v2585_v60 }
 0x79d   :  { %v2600_v2 = vpack.c.bf16 %v2588_v63, %v2586_v62  ;;  %v2562_v3 = vpop.f32.mrb[56].mxu1 }
 0x79e   :  { %v2563_v5 = vadd.f32 %v2562_v3, %v2341_v21  ;;  %v2564_v6 = vpop.f32.mrb[57].mxu1 }
 0x79f   :  { %v2565_v35 = vadd.f32 %v2564_v6, %v2345_v39  ;;  %v2566_v58 = vpop.f32.mrb[58].mxu1  ;;  %2780 = vmatprep.mubr.bf16.mxu1 %v2600_v2 }
 0x7a0   :  { %v2567_v7 = vadd.f32 %v2566_v58, %v2341_v21  ;;  %v2568_v9 = vpop.f32.mrb[59].mxu1  ;;  %2781 = vmatmul.mubr.bf16.gmra.mrb[68].mxu1 %v2599_v1  ;;  %v2589_v11 = vmax.f32 %v2563_v5, 0.0 }
 0x7a1   :  { %v2569_v50 = vadd.f32 %v2568_v9, %v2345_v39  ;;  %v2590_v14 = vmax.f32 %v2565_v35, 0.0 }
 0x7a2   :  { %v2591_v12 = vmax.f32 %v2567_v7, 0.0 }
 0x7a3   :  { %v2592_v15 = vmax.f32 %v2569_v50, 0.0 }
 0x7a4   :  { %v2601_v10 = vpack.c.bf16 %v2591_v12, %v2589_v11 }
 0x7a5   :  { %v2602_v16 = vpack.c.bf16 %v2592_v15, %v2590_v14  ;;  %v2572_v17 = vpop.f32.mrb[60].mxu1 }
 0x7a6   :  { %v2573_v19 = vadd.f32 %v2572_v17, %v2341_v21  ;;  %v2574_v56 = vpop.f32.mrb[61].mxu1 }
 0x7a7   :  { %v2575_v22 = vadd.f32 %v2574_v56, %v2345_v39  ;;  %v2576_v23 = vpop.f32.mrb[62].mxu1  ;;  %2788 = vmatprep.mubr.bf16.mxu1 %v2602_v16 }
 0x7a8   :  { %v2577_v24 = vadd.f32 %v2576_v23, %v2341_v21  ;;  %v2578_v25 = vpop.f32.mrb[63].mxu1  ;;  %2789 = vmatmul.mubr.bf16.gmra.mrb[72].mxu1 %v2601_v10  ;;  %v2593_v31 = vmax.f32 %v2573_v19, 0.0 }
 0x7a9   :  { %v2579_v26 = vadd.f32 %v2578_v25, %v2345_v39  ;;  %v2594_v28 = vmax.f32 %v2575_v22, 0.0 }
 0x7aa   :  { %v2595_v32 = vmax.f32 %v2577_v24, 0.0 }
 0x7ab   :  { %v2596_v29 = vmax.f32 %v2579_v26, 0.0 }
 0x7ac   :  { %v2603_v33 = vpack.c.bf16 %v2595_v32, %v2593_v31 }
 0x7ad   :  { %v2604_v36 = vpack.c.bf16 %v2596_v29, %v2594_v28 }
 0x7af   :  { %2796 = vmatprep.mubr.bf16.mxu1 %v2604_v36 }
 0x7b0   :  { %2797 = vmatmul.mubr.bf16.gmra.mrb[76].mxu1 %v2603_v33 }
 0x86b   :  { %v3181_v37 = vpop.f32.mrb[64].mxu1 }
 0x86c   :  { %v3182_v38 = vpop.f32.mrb[65].mxu1 }
 0x86d   :  { %v3183_v27 = vadd.f32 %v3182_v38, %v3181_v37  ;;  %v3184_v55 = vpop.f32.mrb[66].mxu1 }
 0x86e   :  { %v3185_v30 = vpop.f32.mrb[67].mxu1 }
 0x86f   :  { %v3186_v21 = vadd.f32 %v3185_v30, %v3184_v55  ;;  %v2775_v40 = vadd.f32 %v3183_v27, %v3148_v4 }
 0x871   :  { %2805 = vmax.xlane.f32.xlu0 %v2775_v40  ;;  %v2778_v8 = vadd.f32 %v3186_v21, %v3148_v4 }
 0x873   :  { %v3187_v39 = vpop.f32.mrb[68].mxu1 }
 0x874   :  { %v3188_v20 = vpop.f32.mrb[69].mxu1 }
 0x875   :  { %v3189_v42 = vadd.f32 %v3188_v20, %v3187_v39  ;;  %v3190_v43 = vpop.f32.mrb[70].mxu1  ;;  %2807 = vmax.xlane.f32.xlu0 %v2778_v8 }
 0x876   :  { %v3191_v13 = vpop.f32.mrb[71].mxu1 }
 0x877   :  { %v3192_v34 = vadd.f32 %v3191_v13, %v3190_v43  ;;  %v2783_v0 = vadd.f32 %v3189_v42, %v3148_v4 }
 0x879   :  { %2809 = vmax.xlane.f32.xlu1 %v2783_v0  ;;  %v2786_v45 = vadd.f32 %v3192_v34, %v3148_v4 }
 0x87b   :  { %v3193_v44 = vpop.f32.mrb[72].mxu1 }
 0x87c   :  { %v3194_v46 = vpop.f32.mrb[73].mxu1 }
 0x87d   :  { %v3195_v18 = vadd.f32 %v3194_v46, %v3193_v44  ;;  %v3196_v47 = vpop.f32.mrb[74].mxu1  ;;  %2811 = vmax.xlane.f32.xlu1 %v2786_v45 }
 0x87e   :  { %v3197_v41 = vpop.f32.mrb[75].mxu1 }
 0x87f   :  { %v3198_v51 = vadd.f32 %v3197_v41, %v3196_v47  ;;  %v2791_v48 = vadd.f32 %v3195_v18, %v3148_v4 }
 0x881   :  { %2813 = vmax.xlane.f32.xlu0 %v2791_v48  ;;  %v2794_v53 = vadd.f32 %v3198_v51, %v3148_v4 }
 0x883   :  { %2815 = vmax.xlane.f32.xlu1 %v2794_v53  ;;  %v3199_v52 = vpop.f32.mrb[76].mxu1 }
 0x884   :  { %v3200_v57 = vpop.f32.mrb[77].mxu1 }
 0x885   :  { %v3201_v54 = vadd.f32 %v3200_v57, %v3199_v52  ;;  %v3202_v49 = vpop.f32.mrb[78].mxu1 }
 0x886   :  { %v3203_v59 = vpop.f32.mrb[79].mxu1 }
 0x887   :  { %v3204_v60 = vadd.f32 %v3203_v59, %v3202_v49  ;;  %v2799_v61 = vadd.f32 %v3201_v54, %v3148_v4 }
 0x889   :  { %2817 = vmax.xlane.f32.xlu0 %v2799_v61  ;;  %v2802_v62 = vadd.f32 %v3204_v60, %v3148_v4 }
 0x88b   :  { %2819 = vmax.xlane.f32.xlu1 %v2802_v62 }
 0x8fe   :  { %v2806_v63 = vpop.xlane.xlu0 %2805 }
 0x8ff   :  { %v2821_v1 = vsub.f32 %v2775_v40, %v2806_v63 }
 0x901   :  { %v2829_v2 = vmul.f32 1.442695, %v2821_v1 }
 0x902   :  { %v2808_v3 = vpop.xlane.xlu0 %2807 }
 0x903   :  { %3625 = vpow2.f32 %v2829_v2  ;;  %v4180_v5 = vsub.f32 %v2778_v8, %v2808_v3 }
 0x905   :  { %v2831_v6 = vmul.f32 1.442695, %v4180_v5 }
 0x906   :  { %v2810_v35 = vpop.xlane.xlu1 %2809 }
 0x907   :  { %3627 = vpow2.f32 %v2831_v6  ;;  %v4183_v58 = vsub.f32 %v2783_v0, %v2810_v35 }
 0x909   :  { %v2833_v7 = vmul.f32 1.442695, %v4183_v58 }
 0x90a   :  { %v2812_v9 = vpop.xlane.xlu1 %2811 }
 0x90b   :  { %3629 = vpow2.f32 %v2833_v7  ;;  %v4186_v50 = vsub.f32 %v2786_v45, %v2812_v9 }
 0x90d   :  { %v3626_v11 = vpop.eup %3625  ;;  %v2835_v12 = vmul.f32 1.442695, %v4186_v50 }
 0x90e   :  { %v2814_v14 = vpop.xlane.xlu0 %2813  ;;  %2845 = vadd.xlane.f32.xlu0 %v3626_v11 }
 0x90f   :  { %3631 = vpow2.f32 %v2835_v12  ;;  %v4189_v15 = vsub.f32 %v2791_v48, %v2814_v14 }
 0x910   :  { %v2816_v10 = vpop.xlane.xlu1 %2815 }
 0x911   :  { %v3628_v16 = vpop.eup %3627  ;;  %v2837_v17 = vmul.f32 1.442695, %v4189_v15  ;;  %v4192_v19 = vsub.f32 %v2794_v53, %v2816_v10 }
 0x912   :  { %2847 = vadd.xlane.f32.xlu1 %v3628_v16 }
 0x913   :  { %3633 = vpow2.f32 %v2837_v17  ;;  %v2839_v56 = vmul.f32 1.442695, %v4192_v19 }
 0x915   :  { %v3630_v22 = vpop.eup %3629  ;;  %3635 = vpow2.f32 %v2839_v56 }
 0x916   :  { %2849 = vadd.xlane.f32.xlu0 %v3630_v22  ;;  %v2818_v23 = vpop.xlane.xlu0 %2817 }
 0x917   :  { %v2827_v24 = vsub.f32 %v2799_v61, %v2818_v23 }
 0x918   :  { %v2820_v25 = vpop.xlane.xlu1 %2819 }
 0x919   :  { %v3632_v26 = vpop.eup %3631  ;;  %v2841_v31 = vmul.f32 1.442695, %v2827_v24  ;;  %v2828_v32 = vsub.f32 %v2802_v62, %v2820_v25 }
 0x91a   :  { %2851 = vadd.xlane.f32.xlu1 %v3632_v26 }
 0x91b   :  { %3637 = vpow2.f32 %v2841_v31  ;;  %v2843_v28 = vmul.f32 1.442695, %v2828_v32 }
 0x91d   :  { %v3634_v29 = vpop.eup %3633  ;;  %3639 = vpow2.f32 %v2843_v28 }
 0x91e   :  { %2853 = vadd.xlane.f32.xlu0 %v3634_v29 }
 0x91f   :  { %v3636_v33 = vpop.eup %3635 }
 0x920   :  { %2855 = vadd.xlane.f32.xlu1 %v3636_v33 }
 0x925   :  { %v3638_v36 = vpop.eup %3637 }
 0x926   :  { %2857 = vadd.xlane.f32.xlu0 %v3638_v36 }
 0x927   :  { %v3640_v37 = vpop.eup %3639 }
 0x928   :  { %2859 = vadd.xlane.f32.xlu1 %v3640_v37 }
 0x99b   :  { %v2846_v38 = vpop.xlane.xlu0 %2845 }
 0x99c   :  { %3641 = vlog2.f32 %v2846_v38 }
 0x99f   :  { %v2848_v4 = vpop.xlane.xlu1 %2847 }
 0x9a0   :  { %3643 = vlog2.f32 %v2848_v4 }
 0x9a3   :  { %v2850_v27 = vpop.xlane.xlu0 %2849 }
 0x9a4   :  { %3645 = vlog2.f32 %v2850_v27 }
 0x9a6   :  { %v3642_v55 = vpop.eup %3641 }
 0x9a7   :  { %v2862_v30 = vmul.f32 0.6931472, %v3642_v55  ;;  %v2852_v21 = vpop.xlane.xlu1 %2851 }
 0x9a8   :  { %3647 = vlog2.f32 %v2852_v21 }
 0x9a9   :  { %v2877_v40 = vsub.f32 %v2821_v1, %v2862_v30 }
 0x9aa   :  { %v3644_v39 = vpop.eup %3643 }
 0x9ab   :  { %2885 = vst [vmem:[%s4238_s14] sm:$0xff] %v2877_v40  ;;  %v2864_v8 = vmul.f32 0.6931472, %v3644_v39  ;;  %v2854_v20 = vpop.xlane.xlu0 %2853 }
 0x9ac   :  { %3649 = vlog2.f32 %v2854_v20 }
 0x9ad   :  { %v2878_v42 = vsub.f32 %v4180_v5, %v2864_v8  ;;  %v2856_v43 = vpop.xlane.xlu1 %2855 }
 0x9ae   :  { %v3646_v13 = vpop.eup %3645  ;;  %3651 = vlog2.f32 %v2856_v43 }
 0x9af   :  { %2886 = vst [vmem:[%s4238_s14 + $0x8] sm:$0xff] %v2878_v42  ;;  %v2866_v34 = vmul.f32 0.6931472, %v3646_v13 }
 0x9b1   :  { %v2879_v0 = vsub.f32 %v4183_v58, %v2866_v34 }
 0x9b2   :  { %v3648_v44 = vpop.eup %3647 }
 0x9b3   :  { %2887 = vst [vmem:[%s4238_s14 + $0x10] sm:$0xff] %v2879_v0  ;;  %v2868_v45 = vmul.f32 0.6931472, %v3648_v44  ;;  %v2858_v46 = vpop.xlane.xlu0 %2857 }
 0x9b4   :  { %3653 = vlog2.f32 %v2858_v46 }
 0x9b5   :  { %v2880_v18 = vsub.f32 %v4186_v50, %v2868_v45  ;;  %v2860_v47 = vpop.xlane.xlu1 %2859 }
 0x9b6   :  { %v3650_v41 = vpop.eup %3649  ;;  %3655 = vlog2.f32 %v2860_v47 }
 0x9b7   :  { %2888 = vst [vmem:[%s4238_s14 + $0x18] sm:$0xff] %v2880_v18  ;;  %v2870_v51 = vmul.f32 0.6931472, %v3650_v41 }
 0x9b8   :  { %v3652_v48 = vpop.eup %3651 }
 0x9b9   :  { %v2881_v53 = vsub.f32 %v4189_v15, %v2870_v51  ;;  %v2872_v52 = vmul.f32 0.6931472, %v3652_v48 }
 0x9bb   :  { %2889 = vst [vmem:[%s4238_s14 + $0x20] sm:$0xff] %v2881_v53  ;;  %v2882_v57 = vsub.f32 %v4192_v19, %v2872_v52 }
 0x9bd   :  { %2890 = vst [vmem:[%s4238_s14 + $0x28] sm:$0xff] %v2882_v57 }
 0x9be   :  { %v3654_v54 = vpop.eup %3653 }
 0x9bf   :  { %v2874_v49 = vmul.f32 0.6931472, %v3654_v54 }
 0x9c0   :  { %v3656_v59 = vpop.eup %3655 }
 0x9c1   :  { %v2883_v60 = vsub.f32 %v2827_v24, %v2874_v49  ;;  %v2876_v61 = vmul.f32 0.6931472, %v3656_v59 }
 0x9c3   :  { %2891 = vst [vmem:[%s4238_s14 + $0x30] sm:$0xff] %v2883_v60  ;;  %v2884_v62 = vsub.f32 %v2828_v32, %v2876_v61 }
 0x9c5   :  { %2892 = vst [vmem:[%s4238_s14 + $0x38] sm:$0xff] %v2884_v62 }
 0x9c6   :  { %2897 = vsyncpa [#allocation3], 1 }
 0x9c7   :  { %2898 = vsyncpa [#allocation5], 1 }
 0x9c8   :  { %2899 = vsyncpa [#allocation8], 1 }

</bundles_post_ra>
